<compile_context>
chip_gen: v7x
topology: tpu7x:2x2x1
jax: 0.10.0
libtpu: 0.0.40
codegen_flags: <defaults>
</compile_context>

<pallas_src>
import functools

import jax
import jax.numpy as jnp
from jax.experimental import pallas as pl
from jax.experimental.pallas import tpu as pltpu


_VMEM_LIMIT = 48 * 1024 * 1024


def _round_up(x, m):
    return (x + m - 1) // m * m


# ----------------------------------------------------------------------------
# Fused matmul + bias (+ residual) (+ ReLU): whole-K, bf16 operands, f32 acc.
# ----------------------------------------------------------------------------
def _mm_kernel(a_ref, w_ref, b_ref, o_ref, *, relu):
    acc = jnp.dot(a_ref[...], w_ref[...], preferred_element_type=jnp.float32)
    r = acc + b_ref[...]
    if relu:
        r = jnp.maximum(r, 0.0)
    o_ref[...] = r.astype(o_ref.dtype)


def _mm_res_kernel(a_ref, w_ref, b_ref, r_ref, o_ref, *, relu):
    acc = jnp.dot(a_ref[...], w_ref[...], preferred_element_type=jnp.float32)
    r = acc + b_ref[...] + r_ref[...].astype(jnp.float32)
    if relu:
        r = jnp.maximum(r, 0.0)
    o_ref[...] = r.astype(o_ref.dtype)


def matmul_bias(a, w, b, *, residual=None, relu=False, out_dtype=jnp.bfloat16):
    """out = (relu)(a @ w + b [+ residual]).  a:(M,K), w:(K,N) bf16, b:(1,N) f32."""
    M, K = a.shape
    Kw, N = w.shape
    assert K == Kw
    a = a.astype(jnp.bfloat16)

    # Row tiling: no padding of A -- partial last block is masked on store.
    tm = 256 if M >= 256 else M
    if N % 128 == 0:
        tn = 256 if N >= 512 else 128
    else:
        tn = N                                   # tiny head outputs (21 / 64)
    grid = (pl.cdiv(M, tm), N // tn)

    in_specs = [
        pl.BlockSpec((tm, K), lambda i, j: (i, 0)),
        pl.BlockSpec((K, tn), lambda i, j: (0, j)),
        pl.BlockSpec((1, tn), lambda i, j: (0, j)),
    ]
    args = [a, w, b]
    if residual is not None:
        in_specs.append(pl.BlockSpec((tm, tn), lambda i, j: (i, j)))
        args.append(residual.astype(jnp.bfloat16))
        kern = functools.partial(_mm_res_kernel, relu=relu)
    else:
        kern = functools.partial(_mm_kernel, relu=relu)

    return pl.pallas_call(
        kern,
        out_shape=jax.ShapeDtypeStruct((M, N), out_dtype),
        grid=grid,
        in_specs=in_specs,
        out_specs=pl.BlockSpec((tm, tn), lambda i, j: (i, j)),
        compiler_params=pltpu.CompilerParams(
            dimension_semantics=("parallel", "parallel"),
            vmem_limit_bytes=_VMEM_LIMIT,
        ),
    )(*args)


# ----------------------------------------------------------------------------
# 3x3 / stride-1 / pad-1 conv WITHOUT im2col: halo-window tap accumulation.
# The padded activation is flattened to (B*Hp*Wp, Cin); for "frame" row q the
# tap (di,dj) reads row q + di*Wp + dj, so a (2*tm, Cin) VMEM window (tiles i
# and i+1) covers all 9 shifted whole-K matmuls for an output tile of tm rows.
# True outputs live at frame rows b*Hp*Wp + ho*Wp + wo and are sliced out.
# ----------------------------------------------------------------------------
def _conv3x3_kernel(a_lo_ref, a_hi_ref, w_ref, b_ref, o_ref, awin_ref,
                    *, cin, wp, tm, relu):
    awin_ref[0:tm, :] = a_lo_ref[...]
    awin_ref[tm:2 * tm, :] = a_hi_ref[...]
    tn = o_ref.shape[1]
    acc = jnp.zeros((tm, tn), jnp.float32)
    for di in range(3):
        for dj in range(3):
            off = di * wp + dj                       # static, in [0, 2*wp+2]
            a_tap = awin_ref[off:off + tm, :]
            w_tap = w_ref[(di * 3 + dj) * cin:(di * 3 + dj + 1) * cin, :]
            acc = acc + jnp.dot(a_tap, w_tap,
                                preferred_element_type=jnp.float32)
    r = acc + b_ref[...]
    if relu:
        r = jnp.maximum(r, 0.0)
    o_ref[...] = r.astype(o_ref.dtype)


def conv3x3_s1(x, w2, b2, *, relu=True):
    """3x3, stride 1, pad 1 conv on NHWC x; w2 is the (9*Cin, Cout) bf16 matrix."""
    B, H, W, Cin = x.shape
    Cout = w2.shape[1]
    Wp = W + 2

    tm = min(256, _round_up(B * (H + 2) * Wp, 8))
    tm = max(tm, _round_up(2 * Wp + 2, 8))           # window must hold all taps
    # Extra bottom padding so block i+1 of the last grid step stays in bounds.
    e = max(0, -(-(2 * tm - 1) // Wp) - 2)
    Hp = H + 2 + e

    xp = jnp.pad(x.astype(jnp.bfloat16), ((0, 0), (1, 1 + e), (1, 1), (0, 0)))
    Mx = B * Hp * Wp
    xpf = xp.reshape(Mx, Cin)                         # free (row-major) reshape

    m_needed = (B - 1) * Hp * Wp + H * Wp             # covers every valid frame row
    grid_m = pl.cdiv(m_needed, tm)
    assert (grid_m + 1) * tm <= Mx

    if Cout % 128 == 0:
        tn = 256 if Cout >= 512 else 128
    else:
        tn = Cout
    grid = (grid_m, Cout // tn)

    kern = functools.partial(_conv3x3_kernel, cin=Cin, wp=Wp, tm=tm, relu=relu)
    outf = pl.pallas_call(
        kern,
        out_shape=jax.ShapeDtypeStruct((Mx, Cout), jnp.bfloat16),
        grid=grid,
        in_specs=[
            pl.BlockSpec((tm, Cin), lambda i, j: (i, 0)),
            pl.BlockSpec((tm, Cin), lambda i, j: (i + 1, 0)),   # halo tile
            pl.BlockSpec((9 * Cin, tn), lambda i, j: (0, j)),
            pl.BlockSpec((1, tn), lambda i, j: (0, j)),
        ],
        out_specs=pl.BlockSpec((tm, tn), lambda i, j: (i, j)),
        scratch_shapes=[pltpu.VMEM((2 * tm, Cin), jnp.bfloat16)],
        compiler_params=pltpu.CompilerParams(
            dimension_semantics=("parallel", "parallel"),
            vmem_limit_bytes=_VMEM_LIMIT,
        ),
    )(xpf, xpf, w2, b2)

    return outf.reshape(B, Hp, Wp, Cout)[:, :H, :W, :]


# ----------------------------------------------------------------------------
# 3x3 / stride-2 / pad-1 max pool: single padded operand; stride-2 taps become
# unit slices after free parity-split reshapes (H -> (H/2,2), W-pairs -> lanes).
# ----------------------------------------------------------------------------
def _maxpool_kernel(x_ref, o_ref, *, ho, wo, c):
    x = x_ref[...]                       # (B, Hh, 2, Wh, 2C)
    h_even = x[:, :, 0]                  # padded rows 0,2,4,...
    h_odd = x[:, :, 1]                   # padded rows 1,3,5,...
    mh = jnp.maximum(jnp.maximum(h_even[:, 0:ho], h_odd[:, 0:ho]),
                     h_even[:, 1:ho + 1])
    a = mh[:, :, 0:wo, 0:c]
    b = mh[:, :, 0:wo, c:2 * c]
    d = mh[:, :, 1:wo + 1, 0:c]
    o_ref[...] = jnp.maximum(jnp.maximum(a, b), d)


def maxpool_3x3_s2(x):
    B, H, W, C = x.shape
    assert H % 2 == 0 and W % 2 == 0
    Ho, Wo = H // 2, W // 2
    xp = jnp.pad(x, ((0, 0), (1, 1), (1, 1), (0, 0)), constant_values=-jnp.inf)
    Hh, Wh = (H + 2) // 2, (W + 2) // 2
    xps = xp.reshape(B, Hh, 2, Wh, 2 * C)            # free (row-major) reshape
    kern = functools.partial(_maxpool_kernel, ho=Ho, wo=Wo, c=C)
    return pl.pallas_call(
        kern,
        out_shape=jax.ShapeDtypeStruct((B, Ho, Wo, C), x.dtype),
        grid=(1,),
        in_specs=[pl.BlockSpec((B, Hh, 2, Wh, 2 * C),
                               lambda i: (0, 0, 0, 0, 0))],
        out_specs=pl.BlockSpec((B, Ho, Wo, C), lambda i: (0, 0, 0, 0)),
        compiler_params=pltpu.CompilerParams(vmem_limit_bytes=_VMEM_LIMIT),
    )(xps)


# ----------------------------------------------------------------------------
# Global average pool (tiled over channels, lane = channel axis)
# ----------------------------------------------------------------------------
def _gap_kernel(x_ref, o_ref, *, inv):
    o_ref[...] = jnp.sum(x_ref[...].astype(jnp.float32), axis=1) * inv


def global_avgpool(x):
    B, H, W, C = x.shape
    xr = x.reshape(B, H * W, C)
    tc = 256 if C % 256 == 0 else C
    return pl.pallas_call(
        functools.partial(_gap_kernel, inv=1.0 / (H * W)),
        out_shape=jax.ShapeDtypeStruct((B, C), jnp.float32),
        grid=(C // tc,),
        in_specs=[pl.BlockSpec((B, H * W, tc), lambda i: (0, 0, i))],
        out_specs=pl.BlockSpec((B, tc), lambda i: (0, i)),
        compiler_params=pltpu.CompilerParams(
            dimension_semantics=("parallel",),
            vmem_limit_bytes=_VMEM_LIMIT),
    )(xr)


# ----------------------------------------------------------------------------
# Conv wrappers (1x1 = plain matmul; 3x3 s1 = halo kernel; strided k>1 = im2col)
# ----------------------------------------------------------------------------
def _im2col(x, k, stride, pad):
    B, H, W, C = x.shape
    if pad > 0:
        x = jnp.pad(x, ((0, 0), (pad, pad), (pad, pad), (0, 0)))
    Ho = (H + 2 * pad - k) // stride + 1
    Wo = (W + 2 * pad - k) // stride + 1
    cols = [x[:, i:i + stride * Ho:stride, j:j + stride * Wo:stride, :]
            for i in range(k) for j in range(k)]
    patches = jnp.stack(cols, axis=3)                # (B,Ho,Wo,k*k,C)
    return patches.reshape(B * Ho * Wo, k * k * C), (B, Ho, Wo)


def conv2d(x, w2, b2, k, *, stride=1, pad=0, relu=False, residual=None):
    Cout = w2.shape[1]
    if k == 3 and stride == 1 and residual is None:
        return conv3x3_s1(x, w2, b2, relu=relu)
    if k == 1:
        if stride > 1:
            x = x[:, ::stride, ::stride, :]
        B, Ho, Wo, Cin = x.shape
        a = x.reshape(B * Ho * Wo, Cin)
    else:
        a, (B, Ho, Wo) = _im2col(x, k, stride, pad)
    res2 = None if residual is None else residual.reshape(B * Ho * Wo, Cout)
    out = matmul_bias(a, w2, b2, relu=relu, residual=res2)
    return out.reshape(B, Ho, Wo, Cout)


# ----------------------------------------------------------------------------
# ResNet50 parameters (deterministic synthetic; BN folded; pre-cast/reshaped)
# ----------------------------------------------------------------------------
LAYERS_CFG = [(64, 3, 1), (128, 4, 2), (256, 6, 2), (512, 3, 2)]


def _conv_param(key, k, cin, cout):
    std = (2.0 / (k * k * cin)) ** 0.5 * 0.5
    w = std * jax.random.normal(key, (k, k, cin, cout), jnp.float32)
    return {"w": w.reshape(k * k * cin, cout).astype(jnp.bfloat16),
            "b": jnp.zeros((1, cout), jnp.float32)}


def _lin_w(key, din, dout):
    return ((1.0 / din) ** 0.5) * jax.random.normal(key, (din, dout), jnp.float32)


def init_params(key):
    cnt = [0]

    def nk():
        cnt[0] += 1
        return jax.random.fold_in(key, cnt[0])

    params = {"conv1": _conv_param(nk(), 7, 3, 64)}
    in_ch = 64
    layers = []
    for width, nblocks, _stride in LAYERS_CFG:
        layer = []
        for bi in range(nblocks):
            blk = {
                "conv1": _conv_param(nk(), 1, in_ch, width),
                "conv2": _conv_param(nk(), 3, width, width),
                "conv3": _conv_param(nk(), 1, width, 4 * width),
            }
            if bi == 0:
                blk["down"] = _conv_param(nk(), 1, in_ch, 4 * width)
            layer.append(blk)
            in_ch = 4 * width
        layers.append(layer)
    params["layers"] = layers

    # fc_intrinsic = Linear(2048,128)+ReLU+Linear(128,9)
    # fc_extrinsic = Linear(2048,128)+ReLU+Linear(128,12)
    # fused into one (2048,256) matmul + one block-diagonal (256,21) matmul.
    wi1, wi2 = _lin_w(nk(), 2048, 128), _lin_w(nk(), 128, 9)
    we1, we2 = _lin_w(nk(), 2048, 128), _lin_w(nk(), 128, 12)
    w1 = jnp.concatenate([wi1, we1], axis=1)
    w2 = jnp.zeros((256, 21), jnp.float32)
    w2 = w2.at[:128, :9].set(wi2)
    w2 = w2.at[128:, 9:].set(we2)
    params["head1"] = {"w": w1.astype(jnp.bfloat16),
                       "b": jnp.zeros((1, 256), jnp.float32)}
    params["head2"] = {"w": w2.astype(jnp.bfloat16),
                       "b": jnp.zeros((1, 21), jnp.float32)}
    return params


# ----------------------------------------------------------------------------
# Forward pass
# ----------------------------------------------------------------------------
def _bottleneck(x, blk, stride):
    out = conv2d(x, blk["conv1"]["w"], blk["conv1"]["b"], 1, relu=True)
    out = conv2d(out, blk["conv2"]["w"], blk["conv2"]["b"], 3,
                 stride=stride, pad=1, relu=True)
    if "down" in blk:
        identity = conv2d(x, blk["down"]["w"], blk["down"]["b"], 1, stride=stride)
    else:
        identity = x
    # conv3 (1x1) with the residual add + ReLU fused into the matmul epilogue.
    return conv2d(out, blk["conv3"]["w"], blk["conv3"]["b"], 1,
                  relu=True, residual=identity)


def camera_pose_forward(x_nchw, params):
    x = jnp.transpose(x_nchw, (0, 2, 3, 1)).astype(jnp.bfloat16)

    x = conv2d(x, params["conv1"]["w"], params["conv1"]["b"], 7,
               stride=2, pad=3, relu=True)
    x = maxpool_3x3_s2(x)

    for layer_params, (_width, _nblocks, stride) in zip(params["layers"],
                                                        LAYERS_CFG):
        for bi, blk in enumerate(layer_params):
            x = _bottleneck(x, blk, stride if bi == 0 else 1)

    feats = global_avgpool(x)                               # (B, 2048) f32

    h = matmul_bias(feats, params["head1"]["w"], params["head1"]["b"],
                    relu=True)                              # (B, 256) bf16
    out = matmul_bias(h, params["head2"]["w"], params["head2"]["b"],
                      out_dtype=jnp.float32)                # (B, 21) f32
    intrinsic = out[:, :9].reshape(-1, 3, 3)
    extrinsic = out[:, 9:21].reshape(-1, 3, 4)
    return intrinsic, extrinsic


# ----------------------------------------------------------------------------
# Small correctness self-tests for the custom kernels (run eagerly, tiny shapes)
# ----------------------------------------------------------------------------
def _self_test(key):
    kx, kw, kp = jax.random.split(key, 3)
    # 3x3 stride-1 halo conv vs lax.conv
    B, H, W, Cin, Cout = 2, 8, 8, 32, 64
    x = jax.random.normal(kx, (B, H, W, Cin), jnp.float32).astype(jnp.bfloat16)
    w = 0.1 * jax.random.normal(kw, (3, 3, Cin, Cout), jnp.float32)
    w2 = w.reshape(9 * Cin, Cout).astype(jnp.bfloat16)
    b2 = jnp.zeros((1, Cout), jnp.float32)
    got = conv3x3_s1(x, w2, b2, relu=False).astype(jnp.float32)
    ref = jax.lax.conv_general_dilated(
        x.astype(jnp.float32),
        w2.astype(jnp.float32).reshape(3, 3, Cin, Cout),
        window_strides=(1, 1), padding="SAME",
        dimension_numbers=("NHWC", "HWIO", "NHWC"))
    assert jnp.allclose(got, ref, atol=0.2, rtol=0.05), "conv3x3 halo mismatch"

    # maxpool vs strided-view reference
    xpool = jax.random.normal(kp, (2, 8, 8, 64), jnp.float32).astype(jnp.bfloat16)
    gotp = maxpool_3x3_s2(xpool)
    xpad = jnp.pad(xpool.astype(jnp.float32), ((0, 0), (1, 1), (1, 1), (0, 0)),
                   constant_values=-jnp.inf)
    views = [xpad[:, di:di + 8:2, dj:dj + 8:2, :]
             for di in range(3) for dj in range(3)]
    refp = functools.reduce(jnp.maximum, views).astype(xpool.dtype)
    assert jnp.array_equal(gotp, refp), "maxpool mismatch"


# ----------------------------------------------------------------------------
if __name__ == "__main__":
    key = jax.random.PRNGKey(0)
    _self_test(jax.random.fold_in(key, 999))

    params = init_params(jax.random.fold_in(key, 123))
    x = jax.random.normal(jax.random.fold_in(key, 7), (2, 3, 32, 32), jnp.float32)

    fwd = jax.jit(camera_pose_forward)
    intrinsic, extrinsic = fwd(x, params)
    jax.block_until_ready((intrinsic, extrinsic))

    assert intrinsic.shape == (2, 3, 3) and intrinsic.dtype == jnp.float32
    assert extrinsic.shape == (2, 3, 4) and extrinsic.dtype == jnp.float32
    print("KERNEL_OK")
</pallas_src>

<mosaic_0001>
module attributes {stable_mosaic.version = 11 : i64} {
  func.func @_conv3x3_kernel(%arg0: i32, %arg1: i32, %arg2: memref<200x32xbf16, #tpu.memory_space<vmem>>, %arg3: memref<200x32xbf16, #tpu.memory_space<vmem>>, %arg4: memref<288x64xbf16, #tpu.memory_space<vmem>>, %arg5: memref<1x64xf32, #tpu.memory_space<vmem>>, %arg6: memref<200x64xbf16, #tpu.memory_space<vmem>>, %arg7: memref<400x32xbf16, #tpu.memory_space<vmem>>) attributes {dimension_semantics = [#tpu.dimension_semantics<parallel>, #tpu.dimension_semantics<parallel>], iteration_bounds = array<i64: 3, 1>, scalar_prefetch = 0 : i64, scratch_operands = 1 : i64, tpu.core_type = #tpu.core_type<tc>, window_params = [{transform_indices = @transform_0, window_bounds = array<i64: 200, 32>}, {transform_indices = @transform_1, window_bounds = array<i64: 200, 32>}, {transform_indices = @transform_2, window_bounds = array<i64: 288, 64>}, {transform_indices = @transform_3, window_bounds = array<i64: 1, 64>}, {transform_indices = @transform_4, window_bounds = array<i64: 200, 64>}]} {
    %c0 = arith.constant 0 : index
    %c0_0 = arith.constant 0 : index
    %0 = vector.load %arg2[%c0, %c0_0] : memref<200x32xbf16, #tpu.memory_space<vmem>>, vector<200x32xbf16>
    %c0_1 = arith.constant 0 : index
    %c0_2 = arith.constant 0 : index
    %1 = vector.load %arg7[%c0_1, %c0_2] : memref<400x32xbf16, #tpu.memory_space<vmem>>, vector<200x32xbf16>
    tpu.vector_store %arg7[%c0_1, %c0_2], %0 {strides = array<i32>} : memref<400x32xbf16, #tpu.memory_space<vmem>>, vector<200x32xbf16>,
    %c0_3 = arith.constant 0 : index
    %c0_4 = arith.constant 0 : index
    %2 = vector.load %arg3[%c0_3, %c0_4] : memref<200x32xbf16, #tpu.memory_space<vmem>>, vector<200x32xbf16>
    %c200 = arith.constant 200 : index
    %c0_5 = arith.constant 0 : index
    %3 = vector.load %arg7[%c200, %c0_5] : memref<400x32xbf16, #tpu.memory_space<vmem>>, vector<200x32xbf16>
    tpu.vector_store %arg7[%c200, %c0_5], %2 {strides = array<i32>} : memref<400x32xbf16, #tpu.memory_space<vmem>>, vector<200x32xbf16>,
    %cst = arith.constant 0.000000e+00 : f32
    %4 = vector.broadcast %cst : f32 to vector<200x64xf32>
    %c0_6 = arith.constant 0 : index
    %c0_7 = arith.constant 0 : index
    %5 = vector.load %arg7[%c0_6, %c0_7] : memref<400x32xbf16, #tpu.memory_space<vmem>>, vector<200x32xbf16>
    %c0_8 = arith.constant 0 : index
    %c0_9 = arith.constant 0 : index
    %6 = vector.load %arg4[%c0_8, %c0_9] : memref<288x64xbf16, #tpu.memory_space<vmem>>, vector<32x64xbf16>
    %cst_10 = arith.constant dense<0.000000e+00> : vector<200x64xf32>
    %7 = tpu.matmul %5, %6, %cst_10 {dimension_numbers = #tpu.dot_dimension_numbers<[1], [0], [0], [1], [0, 0, 1, 1], [], []>} : vector<200x32xbf16>, vector<32x64xbf16>, vector<200x64xf32> -> vector<200x64xf32>
    %8 = arith.addf %4, %7 : vector<200x64xf32>
    %c1 = arith.constant 1 : index
    %c0_11 = arith.constant 0 : index
    %9 = vector.load %arg7[%c1, %c0_11] : memref<400x32xbf16, #tpu.memory_space<vmem>>, vector<200x32xbf16>
    %c32 = arith.constant 32 : index
    %c0_12 = arith.constant 0 : index
    %10 = vector.load %arg4[%c32, %c0_12] : memref<288x64xbf16, #tpu.memory_space<vmem>>, vector<32x64xbf16>
    %cst_13 = arith.constant dense<0.000000e+00> : vector<200x64xf32>
    %11 = tpu.matmul %9, %10, %cst_13 {dimension_numbers = #tpu.dot_dimension_numbers<[1], [0], [0], [1], [0, 0, 1, 1], [], []>} : vector<200x32xbf16>, vector<32x64xbf16>, vector<200x64xf32> -> vector<200x64xf32>
    %12 = arith.addf %8, %11 : vector<200x64xf32>
    %c2 = arith.constant 2 : index
    %c0_14 = arith.constant 0 : index
    %13 = vector.load %arg7[%c2, %c0_14] : memref<400x32xbf16, #tpu.memory_space<vmem>>, vector<200x32xbf16>
    %c64 = arith.constant 64 : index
    %c0_15 = arith.constant 0 : index
    %14 = vector.load %arg4[%c64, %c0_15] : memref<288x64xbf16, #tpu.memory_space<vmem>>, vector<32x64xbf16>
    %cst_16 = arith.constant dense<0.000000e+00> : vector<200x64xf32>
    %15 = tpu.matmul %13, %14, %cst_16 {dimension_numbers = #tpu.dot_dimension_numbers<[1], [0], [0], [1], [0, 0, 1, 1], [], []>} : vector<200x32xbf16>, vector<32x64xbf16>, vector<200x64xf32> -> vector<200x64xf32>
    %16 = arith.addf %12, %15 : vector<200x64xf32>
    %c10 = arith.constant 10 : index
    %c0_17 = arith.constant 0 : index
    %17 = vector.load %arg7[%c10, %c0_17] : memref<400x32xbf16, #tpu.memory_space<vmem>>, vector<200x32xbf16>
    %c96 = arith.constant 96 : index
    %c0_18 = arith.constant 0 : index
    %18 = vector.load %arg4[%c96, %c0_18] : memref<288x64xbf16, #tpu.memory_space<vmem>>, vector<32x64xbf16>
    %cst_19 = arith.constant dense<0.000000e+00> : vector<200x64xf32>
    %19 = tpu.matmul %17, %18, %cst_19 {dimension_numbers = #tpu.dot_dimension_numbers<[1], [0], [0], [1], [0, 0, 1, 1], [], []>} : vector<200x32xbf16>, vector<32x64xbf16>, vector<200x64xf32> -> vector<200x64xf32>
    %20 = arith.addf %16, %19 : vector<200x64xf32>
    %c11 = arith.constant 11 : index
    %c0_20 = arith.constant 0 : index
    %21 = vector.load %arg7[%c11, %c0_20] : memref<400x32xbf16, #tpu.memory_space<vmem>>, vector<200x32xbf16>
    %c128 = arith.constant 128 : index
    %c0_21 = arith.constant 0 : index
    %22 = vector.load %arg4[%c128, %c0_21] : memref<288x64xbf16, #tpu.memory_space<vmem>>, vector<32x64xbf16>
    %cst_22 = arith.constant dense<0.000000e+00> : vector<200x64xf32>
    %23 = tpu.matmul %21, %22, %cst_22 {dimension_numbers = #tpu.dot_dimension_numbers<[1], [0], [0], [1], [0, 0, 1, 1], [], []>} : vector<200x32xbf16>, vector<32x64xbf16>, vector<200x64xf32> -> vector<200x64xf32>
    %24 = arith.addf %20, %23 : vector<200x64xf32>
    %c12 = arith.constant 12 : index
    %c0_23 = arith.constant 0 : index
    %25 = vector.load %arg7[%c12, %c0_23] : memref<400x32xbf16, #tpu.memory_space<vmem>>, vector<200x32xbf16>
    %c160 = arith.constant 160 : index
    %c0_24 = arith.constant 0 : index
    %26 = vector.load %arg4[%c160, %c0_24] : memref<288x64xbf16, #tpu.memory_space<vmem>>, vector<32x64xbf16>
    %cst_25 = arith.constant dense<0.000000e+00> : vector<200x64xf32>
    %27 = tpu.matmul %25, %26, %cst_25 {dimension_numbers = #tpu.dot_dimension_numbers<[1], [0], [0], [1], [0, 0, 1, 1], [], []>} : vector<200x32xbf16>, vector<32x64xbf16>, vector<200x64xf32> -> vector<200x64xf32>
    %28 = arith.addf %24, %27 : vector<200x64xf32>
    %c20 = arith.constant 20 : index
    %c0_26 = arith.constant 0 : index
    %29 = vector.load %arg7[%c20, %c0_26] : memref<400x32xbf16, #tpu.memory_space<vmem>>, vector<200x32xbf16>
    %c192 = arith.constant 192 : index
    %c0_27 = arith.constant 0 : index
    %30 = vector.load %arg4[%c192, %c0_27] : memref<288x64xbf16, #tpu.memory_space<vmem>>, vector<32x64xbf16>
    %cst_28 = arith.constant dense<0.000000e+00> : vector<200x64xf32>
    %31 = tpu.matmul %29, %30, %cst_28 {dimension_numbers = #tpu.dot_dimension_numbers<[1], [0], [0], [1], [0, 0, 1, 1], [], []>} : vector<200x32xbf16>, vector<32x64xbf16>, vector<200x64xf32> -> vector<200x64xf32>
    %32 = arith.addf %28, %31 : vector<200x64xf32>
    %c21 = arith.constant 21 : index
    %c0_29 = arith.constant 0 : index
    %33 = vector.load %arg7[%c21, %c0_29] : memref<400x32xbf16, #tpu.memory_space<vmem>>, vector<200x32xbf16>
    %c224 = arith.constant 224 : index
    %c0_30 = arith.constant 0 : index
    %34 = vector.load %arg4[%c224, %c0_30] : memref<288x64xbf16, #tpu.memory_space<vmem>>, vector<32x64xbf16>
    %cst_31 = arith.constant dense<0.000000e+00> : vector<200x64xf32>
    %35 = tpu.matmul %33, %34, %cst_31 {dimension_numbers = #tpu.dot_dimension_numbers<[1], [0], [0], [1], [0, 0, 1, 1], [], []>} : vector<200x32xbf16>, vector<32x64xbf16>, vector<200x64xf32> -> vector<200x64xf32>
    %36 = arith.addf %32, %35 : vector<200x64xf32>
    %c22 = arith.constant 22 : index
    %c0_32 = arith.constant 0 : index
    %37 = vector.load %arg7[%c22, %c0_32] : memref<400x32xbf16, #tpu.memory_space<vmem>>, vector<200x32xbf16>
    %c256 = arith.constant 256 : index
    %c0_33 = arith.constant 0 : index
    %38 = vector.load %arg4[%c256, %c0_33] : memref<288x64xbf16, #tpu.memory_space<vmem>>, vector<32x64xbf16>
    %cst_34 = arith.constant dense<0.000000e+00> : vector<200x64xf32>
    %39 = tpu.matmul %37, %38, %cst_34 {dimension_numbers = #tpu.dot_dimension_numbers<[1], [0], [0], [1], [0, 0, 1, 1], [], []>} : vector<200x32xbf16>, vector<32x64xbf16>, vector<200x64xf32> -> vector<200x64xf32>
    %40 = arith.addf %36, %39 : vector<200x64xf32>
    %c0_35 = arith.constant 0 : index
    %c0_36 = arith.constant 0 : index
    %41 = vector.load %arg5[%c0_35, %c0_36] : memref<1x64xf32, #tpu.memory_space<vmem>>, vector<1x64xf32>
    %42 = vector.broadcast %41 : vector<1x64xf32> to vector<200x64xf32>
    %43 = arith.addf %40, %42 : vector<200x64xf32>
    %44 = arith.truncf %43 : vector<200x64xf32> to vector<200x64xbf16>
    %c0_37 = arith.constant 0 : index
    %c0_38 = arith.constant 0 : index
    %45 = vector.load %arg6[%c0_37, %c0_38] : memref<200x64xbf16, #tpu.memory_space<vmem>>, vector<200x64xbf16>
    tpu.vector_store %arg6[%c0_37, %c0_38], %44 {strides = array<i32>} : memref<200x64xbf16, #tpu.memory_space<vmem>>, vector<200x64xbf16>,
    return
  }
  func.func @transform_0(%arg0: i32, %arg1: i32) -> (i32, i32) {
    %c0_i32 = arith.constant 0 : i32
    %c0_i32_0 = arith.constant 0 : i32
    return %arg0, %c0_i32 : i32, i32
  }
  func.func @transform_1(%arg0: i32, %arg1: i32) -> (i32, i32) {
    %c1_i32 = arith.constant 1 : i32
    %0 = arith.addi %arg0, %c1_i32 : i32
    %c0_i32 = arith.constant 0 : i32
    %c0_i32_0 = arith.constant 0 : i32
    return %0, %c0_i32 : i32, i32
  }
  func.func @transform_2(%arg0: i32, %arg1: i32) -> (i32, i32) {
    %c0_i32 = arith.constant 0 : i32
    %c0_i32_0 = arith.constant 0 : i32
    return %c0_i32, %arg1 : i32, i32
  }
  func.func @transform_3(%arg0: i32, %arg1: i32) -> (i32, i32) {
    %c0_i32 = arith.constant 0 : i32
    %c0_i32_0 = arith.constant 0 : i32
    return %c0_i32, %arg1 : i32, i32
  }
  func.func @transform_4(%arg0: i32, %arg1: i32) -> (i32, i32) {
    %c0_i32 = arith.constant 0 : i32
    return %arg0, %arg1 : i32, i32
  }
}

</mosaic_0001>

<bundles_post_ra>
// kernel: tpu_custom_call.1
= control target key start
LH: loop header
LB: loop body
LE: loop exit
PB: predicated region body
PF: predicated region fallthrough
CT: control target
= control target key end

     0   :  { %s4617_s15 = smov 0   ;;  %s4619_s16 = smov 0   ;;  %s6024_s0 = inlined_call_operand.vmem [shape: bf16[960,32], index: 0, kind: input, shape index: {}]   ;;  %s6025_s1 = inlined_call_operand.vmem [shape: bf16[960,32], index: 1, kind: input, shape index: {}]   ;;  %s6026_s2 = inlined_call_operand.vmem [shape: bf16[288,64], index: 2, kind: input, shape index: {}]   ;;  %s6027_s3 = inlined_call_operand.vmem [shape: f32[1,64], index: 3, kind: input, shape index: {}]   ;;  %s6028_s4 = inlined_call_operand.vmem [shape: bf16[960,64], index: 4, kind: output, shape index: {}]  }
   0x1   :  { %s4621_s17 = smov 0   ;;  %s4623_s18 = smov 0  }
   0x2   :  { %s4625_s19 = smov 0  }
   0x3 LB: > { %s3442_s20 = sadd.s32 4294967295, %s4556_s19   ;;  %s26_s21 = sadd.s32 1, %s4552_s18  ;;  %s4556_s19 = sphi %s4625_s19, %s14_s19   ;;  %s4552_s18 = sphi %s4623_s18, %s6066_s18   ;;  %s4548_s17 = sphi %s4621_s17, %s6065_s17   ;;  %s4544_s16 = sphi %s4619_s16, %s6064_s16   ;;  %s4540_s15 = sphi %s4617_s15, %s6063_s15  }
   0x4   : > { %p28_p0 = scmp.ge.s32.totalorder %s26_s21, 3  ;;  %s141_s22 = sadd.s32 1, %s4544_s16 }
   0x5   : > { %p151_p1 = scmp.ne.s32.totalorder %s4544_s16, %s4540_s15  ;;  %p152_p2 = scmp.eq.s32.totalorder %s3442_s20, 2 }
   0x6   : > { %s6068_s21 = smov (%p28_p0, %s26_s21), 0  ;;  %p3448_p4 = scmp.ge.s32.totalorder %s4556_s19, 1 }
   0x7   : > { %p4649_p3 = por %p152_p2, %p151_p1  ;;  %s136_s24 = ssub.s32 %s4552_s18, %s6068_s21 }
   0x8   : > { %p225_p5 = scmp.lt.s32.totalorder %s4556_s19, 4  ;;  %p139_p6 = scmp.eq.s32.totalorder %s136_s24, 0 }
   0xa   : > { %p226_p7 = pnand %p3448_p4, %p225_p5 }
   0xb   : > { %s4658_s25 = scalar_select %p139_p6, %s4544_s16, %s141_s22  }
   0xc   : > { %229 = sbr.rel (%p226_p7) target bundleno = 804 (0x324), region = 36 }
  0x13   : > { %v4427_v0 = vld [vmem:[%s6026_s2 + $0x10] sm:$0xff]   ;;  %v6033_v1 = vmov 0.0   ;;  %v4428_v2 = vld [vmem:[%s6026_s2 + $0x18] sm:$0xff]   ;;  %s4669_s30 = smul.u32 25, %s4548_s17  ;;  %vm4591_vm0 = vmmov 0   ;;  %s285_s5 = sadd.s32 1, %s4548_s17 }
  0x14   : > { %3811 = vmatprep.subr.bf16.mxu0 %v6033_v1  ;;  %4315 = vmatprep.subr.bf16.mxu1 %v6033_v1  ;;  %s286_s7 = smul.u32 25, %s285_s5  ;;  %vm415_vm1 = vcmask 261120   ;;  %vm567_vm2 = vsmask.f32 7424  ;;  %v4433_v27 = vld [vmem:[%s6026_s2 + $0x20] sm:$0xff]   ;;  %vm428_vm3 = vcmask 257024  }
  0x15   : > { %3812 = vmatpush3.bf16.msra.mxu0 %v4427_v0  ;;  %4317 = vmatpush3.bf16.msra.mxu1 %v4427_v0  ;;  %p276_p8 = scmp.lt.s32.totalorder %s4669_s30, 119  ;;  %v4434_v34 = vld [vmem:[%s6026_s2] sm:$0xff]   ;;  %v4441_v44 = vld [vmem:[%s6026_s2 + $0x28] sm:$0xff]   ;;  %vm531_vm4 = vcmask 261124   ;;  %vm1051_vm5 = vcmask 1046528   ;;  %vm1321_vm7 = vcmask 1042432  }
  0x16   : > { %3813 = vmatprep.subr.bf16.mxu0 %v6033_v1  ;;  %4316 = vmatprep.subr.bf16.mxu1 %v6033_v1  ;;  %p291_p9 = scmp.lt.s32.totalorder %s286_s7, 119  ;;  %v4442_v49 = vld [vmem:[%s6026_s2 + $0x8] sm:$0xff]   ;;  %vm1566_vm6 = vsmask.f32 2304  ;;  %vm1911_vm8 = vcmask 1041408   ;;  %vm2159_vm9 = vcmask 1045504  }
  0x17   : > { %3815 = vmatprep.mubr.msk.bf16.mxu0 %vm4591_vm0, %v6033_v1  ;;  %3843 = vmatprep.mubr.msk.bf16.mxu1 %vm4591_vm0, %v6033_v1  ;;  %s277_s6 = scalar_select %p276_p8, %s4669_s30, 119  ;;  %vm2402_vm10 = vsmask.f32 5376  ;;  %vm2683_vm11 = vcmask 1044480   ;;  %vm3054_vm12 = vcmask 519168  }
  0x18   : > { %s6070_s7 = smov (!%p291_p9, %s286_s7), 119  ;;  %s268_s14 = sand.u32 1, %s4540_s15  }
  0x19   : > { %3814 = vmatpush3.bf16.msra.mxu0 %v4428_v2  ;;  %4318 = vmatpush3.bf16.msra.mxu1 %v4428_v2  ;;  %s3449_s8 = sshll.u32 %s277_s6, 2  ;;  %s3450_s12 = sshll.u32 %s6070_s7, 2 }
  0x1a   : > { %3923 = vmatprep.subr.bf16.mxu0 %v6033_v1  ;;  %3867 = vmatprep.subr.bf16.mxu1 %v6033_v1  ;;  %s4685_s11 = scalar_lea.vmem %s6024_s0, %s3449_s8  ;;  %s4722_s20 = scalar_lea.vmem %s6025_s1, %s3450_s12 }
  0x1b   : > { %v4429_v3 = vld [vmem:[%s4685_s11] sm:$0xff]   ;;  %v4430_v4 = vld [vmem:[%s4685_s11 + $0x8] sm:$0xff]   ;;  %v4431_v5 = vld [vmem:[%s4685_s11 + $0x38] sm:$0xff]   ;;  %s3088_s26 = ssub.s32 (%p4649_p3), 120, %s4669_s30  ;;  %s3675_s27 = smul.u32 (%p4649_p3), 100, %s4548_s17 }
  0x1c   : > { %416 = vst.msk [vmem:[#allocation2] sm:$0xff] %vm415_vm1, %v4429_v3  ;;  %417 = vst.msk [vmem:[#allocation2 + $0x8] sm:$0xff] %vm415_vm1, %v4430_v4  ;;  %v4432_v6 = vld [vmem:[%s4685_s11 + $0x40] sm:$0xff]   ;;  %v4435_v7 = vld [vmem:[%s4685_s11 + $0x10] sm:$0xff]   ;;  %p3089_p10 = scmp.lt.s32.totalorder (%p4649_p3), %s3088_s26, 25 }
  0x1d   : > { %423 = vst.msk [vmem:[#allocation2 + $0x38] sm:$0xff] %vm415_vm1, %v4431_v5  ;;  %424 = vst.msk [vmem:[#allocation2 + $0x40] sm:$0xff] %vm415_vm1, %v4432_v6  ;;  %v4436_v8 = vld [vmem:[%s4685_s11 + $0x48] sm:$0xff]   ;;  %v4437_v9 = vld [vmem:[%s4685_s11 + $0x18] sm:$0xff]   ;;  %s5910_s5 = scalar_lea.vmem (%p4649_p3), %s6028_s4, %s3675_s27  }
  0x1e   : > { %418 = vst.msk [vmem:[#allocation2 + $0x10] sm:$0xff] %vm415_vm1, %v4435_v7  ;;  %425 = vst.msk [vmem:[#allocation2 + $0x48] sm:$0xff] %vm415_vm1, %v4436_v8  ;;  %v4438_v10 = vld [vmem:[%s4685_s11 + $0x50] sm:$0xff]   ;;  %v4439_v11 = vld [vmem:[%s4685_s11 + $0x20] sm:$0xff]  }
  0x1f   : > { %419 = vst.msk [vmem:[#allocation2 + $0x18] sm:$0xff] %vm415_vm1, %v4437_v9  ;;  %426 = vst.msk [vmem:[#allocation2 + $0x50] sm:$0xff] %vm415_vm1, %v4438_v10  ;;  %v4440_v12 = vld [vmem:[%s4685_s11 + $0x58] sm:$0xff]   ;;  %v4443_v20 = vld [vmem:[%s4685_s11 + $0x28] sm:$0xff]  }
  0x20   : > { %420 = vst.msk [vmem:[#allocation2 + $0x20] sm:$0xff] %vm415_vm1, %v4439_v11  ;;  %427 = vst.msk [vmem:[#allocation2 + $0x58] sm:$0xff] %vm415_vm1, %v4440_v12  ;;  %v4444_v40 = vld [vmem:[%s4685_s11 + $0x60] ss:$0 sps:$4 sm:$0xff]   ;;  %v4457_v0 = vld [vmem:[%s4685_s11 + $0x30] sm:$0xff]  }
  0x21   : > { %421 = vst.msk [vmem:[#allocation2 + $0x28] sm:$0xff] %vm415_vm1, %v4443_v20  ;;  %v4445_v59 = vld [vmem:[%s4722_s20] ss:$0 sps:$4 sm:$0xff]   ;;  %422 = vst.msk [vmem:[#allocation2 + $0x30] sm:$0xff] %vm415_vm1, %v4457_v0 }
  0x22   : > { %429 = vst.msk [vmem:[#allocation2 + $0x60] sm:$0xf] %vm428_vm3, %v4444_v40 }
  0x23   : > { %v4705_v13 = vld [vmem:[#allocation2] sm:$0xff]  ;;  %v4707_v14 = vld [vmem:[#allocation2 + $0x8] sm:$0xff]  ;;  %532 = vst.msk [vmem:[#allocation2 + $0x60] sm:$0xf0] %vm531_vm4, %v4445_v59 }
  0x24   : > { %v569_v15 = vshrl.u32 %v4705_v13, 16  ;;  %v571_v16 = vshll.u32 %v4705_v13, 16  ;;  %v576_v17 = vshll.u32 %v4707_v14, 16  ;;  %v4714_v18 = vld [vmem:[#allocation2 + $0x38] sm:$0xff]  ;;  %v4716_v19 = vld [vmem:[#allocation2 + $0x40] sm:$0xff]  ;;  %v580_v31 = vshrl.u32 %v4707_v14, 16 }
  0x25   : > { %v4727_v23 = vshll.u32 %v4714_v18, 16  ;;  %v4730_v24 = vshrl.u32 %v4714_v18, 16  ;;  %v4732_v25 = vld [vmem:[#allocation2 + $0x10] sm:$0xff]  ;;  %v4735_v26 = vshll.u32 %v4716_v19, 16  ;;  %v4740_v28 = vld [vmem:[#allocation2 + $0x48] sm:$0xff]  ;;  %v4757_v37 = vshrl.u32 %v4716_v19, 16 }
  0x26   : > { %v573_v21 = vrot.slane %v571_v16, 1  ;;  %v578_v22 = vrot.slane %v576_v17, 1  ;;  %v4746_v32 = vshll.u32 %v4732_v25, 16  ;;  %v4760_v38 = vshll.u32 %v4740_v28, 16  ;;  %v4762_v39 = vld [vmem:[#allocation2 + $0x18] sm:$0xff]  ;;  %v4779_v46 = vld [vmem:[#allocation2 + $0x50] sm:$0xff] }
  0x27   : > { %v626_v30 = vrot.slane %v4727_v23, 1  ;;  %v634_v33 = vrot.slane %v4735_v26, 1  ;;  %v4777_v45 = vshll.u32 %v4762_v39, 16  ;;  %v4790_v50 = vshrl.u32 %v4732_v25, 16  ;;  %v4803_v56 = vld [vmem:[#allocation2 + $0x20] sm:$0xff]  ;;  %v4805_v57 = vld [vmem:[#allocation2 + $0x58] sm:$0xff] }
  0x28   : > { %v574_v29 = vor.u32 %v573_v21, %v569_v15  ;;  %6041 = vst [vmem:[#allocation4_spill] sm:$0xff] %v4760_v38  ;;  %v582_v42 = vor.u32 %v580_v31, %v578_v22  ;;  %v586_v43 = vrot.slane %v4746_v32, 1  ;;  %v642_v48 = vrot.slane %v4760_v38, 1  ;;  %v4838_v8 = vld [vmem:[#allocation2 + $0x28] sm:$0xff] }
  0x29   : > { %v630_v36 = vor.u32 %v4730_v24, %v626_v30  ;;  %v638_v47 = vor.u32 %v4757_v37, %v634_v33  ;;  %v4793_v51 = vshrl.u32 %v4740_v28, 16  ;;  %v4798_v53 = vshll.u32 %v4779_v46, 16 }
  0x2a   : > { %v579_v35 = vsel %vm567_vm2, %v574_v29, %v578_v22  ;;  %v587_v52 = vsel %vm567_vm2, %v582_v42, %v586_v43  ;;  %v594_v54 = vrot.slane %v4777_v45, 1  ;;  %v590_v58 = vor.u32 %v4790_v50, %v586_v43  ;;  %v4847_v11 = vld [vmem:[#allocation2 + $0x60] sm:$0x1f] }
  0x2b   : > { %3816 = vmatmul.mubr.msk.bf16.vlgmr.msra.gmra.mrb[0].mxu0 %vm415_vm1, %v579_v35  ;;  %v635_v41 = vsel %vm567_vm2, %v630_v36, %v634_v33  ;;  %6042 = vst [vmem:[#allocation5_spill] sm:$0xff] %v4793_v51  ;;  %6043 = vst [vmem:[#allocation6_spill] sm:$0xff] %v4798_v53  ;;  %v643_v55 = vsel %vm567_vm2, %v638_v47, %v642_v48  ;;  %v646_v60 = vor.u32 %v4793_v51, %v642_v48  ;;  %v4876_v36 = vld [vmem:[#allocation2 + $0x30] sm:$0xff] }
  0x2c   : > { %3924 = vmatpush3.bf16.msra.mxu0 %v4433_v27  ;;  %3819 = vmatprep.mubr.msk.bf16.mxu0 %vm4591_vm0, %v6033_v1  ;;  %v650_v61 = vrot.slane %v4798_v53, 1  ;;  %v4819_v62 = vshll.u32 %v4803_v56, 16  ;;  %v4822_v63 = vshll.u32 %v4805_v57, 16  ;;  %v595_v2 = vsel %vm567_vm2, %v590_v58, %v594_v54 }
  0x2d   : > { %3844 = vmatmul.mubr.msk.bf16.vlgmr.msra.gmra.mrb[0].mxu1 %vm415_vm1, %v635_v41  ;;  %3925 = vmatprep.subr.bf16.mxu0 %v6033_v1  ;;  %v4828_v3 = vshrl.u32 %v4762_v39, 16  ;;  %v4833_v5 = vshrl.u32 %v4779_v46, 16  ;;  %v4850_v12 = vshrl.u32 %v4803_v56, 16  ;;  %v1075_v15 = vrot.slane %v4847_v11, 1 }
  0x2e   : > { %3868 = vmatpush3.bf16.msra.mxu1 %v4434_v34  ;;  %3847 = vmatprep.mubr.msk.bf16.mxu1 %vm4591_vm0, %v6033_v1  ;;  %6044 = vst [vmem:[#allocation7_spill] sm:$0xff] %v4822_v63  ;;  %v651_v4 = vsel %vm567_vm2, %v646_v60, %v650_v61  ;;  %v602_v6 = vrot.slane %v4819_v62, 1  ;;  %v658_v7 = vrot.slane %v4822_v63, 1  ;;  %v4855_v20 = vshll.u32 %v4838_v8, 16 }
  0x2f   : > { %3869 = vmatprep.subr.bf16.mxu1 %v6033_v1  ;;  %6045 = vst [vmem:[#allocation8_spill] sm:$0xff] %v4833_v5  ;;  %v598_v9 = vor.u32 %v4828_v3, %v594_v54  ;;  %v654_v10 = vor.u32 %v4833_v5, %v650_v61  ;;  %v1073_v21 = vrot.slane %v4805_v57, 1  ;;  %v4860_v27 = vshrl.u32 %v4805_v57, 16 }
  0x30   : > { %3926 = vmatpush3.bf16.msra.mxu0 %v4441_v44  ;;  %v664_v29 = vshll.u32 %v4847_v11, 16  ;;  %v606_v34 = vor.u32 %v4850_v12, %v602_v6  ;;  %v610_v35 = vrot.slane %v4855_v20, 1  ;;  %v4883_v43 = vshrl.u32 %v4838_v8, 16 }
  0x31   : > { %4035 = vmatprep.subr.bf16.mxu0 %v6033_v1  ;;  %v603_v16 = vsel %vm567_vm2, %v598_v9, %v602_v6  ;;  %v659_v22 = vsel %vm567_vm2, %v654_v10, %v658_v7  ;;  %6046 = vst [vmem:[#allocation9_spill] sm:$0xff] %v4860_v27  ;;  %v4868_v33 = vsel %vm1051_vm5, %v1073_v21, %v1075_v15  ;;  %v4886_v44 = vshll.u32 %v4876_v36, 16  ;;  %v4458_v9 = vld [vmem:[%s6026_s2 + $0x30] sm:$0xff]  }
  0x32   : > { %3870 = vmatpush3.bf16.msra.mxu1 %v4442_v49  ;;  %v662_v40 = vor.u32 %v4860_v27, %v658_v7  ;;  %v666_v41 = vrot.slane %v664_v29, 1  ;;  %v611_v42 = vsel %vm567_vm2, %v606_v34, %v610_v35  ;;  %v1578_v47 = vrot.slane %v580_v31, 5  ;;  %v1033_v7 = vld [vmem:[#allocation2] sm:$0xfe]  ;;  %v4461_v34 = vld [vmem:[%s6026_s2 + $0x48] sm:$0xff]  }
  0x33   : > { %3820 = vmatmul.mubr.msk.bf16.gmra.mrb[4].mxu0 %vm415_vm1, %v587_v52  ;;  %3979 = vmatprep.subr.bf16.mxu1 %v6033_v1  ;;  %v1581_v48 = vrot.slane %v576_v17, 6  ;;  %v614_v54 = vor.u32 %v4883_v43, %v610_v35  ;;  %v668_v31 = vshrl.u32 %v4847_v11, 16  ;;  %v4906_v58 = vshrl.u32 %v4876_v36, 16  ;;  %v4459_v29 = vld [vmem:[%s6026_s2 + $0x40] sm:$0xff]  }
  0x34   : > { %3823 = vmatprep.mubr.msk.bf16.mxu0 %vm4591_vm0, %v6033_v1  ;;  %v667_v49 = vsel %vm567_vm2, %v662_v40, %v666_v41  ;;  %v1587_v59 = vrot.slane %v4790_v50, 5  ;;  %v1590_v60 = vrot.slane %v4746_v32, 6  ;;  %v1052_v10 = vrot.slane %v1033_v7, 1 }
  0x35   : > { %3848 = vmatmul.mubr.msk.bf16.gmra.mrb[4].mxu1 %vm415_vm1, %v643_v55  ;;  %v4894_v52 = vor.u32 %v1581_v48, %v1578_v47  ;;  %v618_v55 = vrot.slane %v4886_v44, 1  ;;  %v670_v61 = vor.u32 %v668_v31, %v666_v41  ;;  %v1057_v40 = vrot.slane %v4762_v39, 1 }
  0x36   : > { %3851 = vmatprep.mubr.msk.bf16.mxu1 %vm4591_vm0, %v6033_v1  ;;  %v4910_v0 = vor.u32 %v1590_v60, %v1587_v59  ;;  %v1061_v48 = vrot.slane %v4838_v8, 1  ;;  %v1065_v31 = vrot.slane %v4714_v18, 1  ;;  %v1067_v59 = vrot.slane %v4716_v19, 1 }
  0x37   : > { %v619_v17 = vsel %vm567_vm2, %v614_v54, %v618_v55  ;;  %v1063_v54 = vrot.slane %v4876_v36, 1  ;;  %v1071_v7 = vrot.slane %v4779_v46, 1 }
  0x38   : > { %v1068_v60 = vsel %vm1051_vm5, %v1065_v31, %v1067_v59 }
  0x3b   : > { %3824 = vmatmul.mubr.msk.bf16.gmra.mrb[8].mxu0 %vm415_vm1, %v595_v2  ;;  %v622_v2 = vor.u32 %v4906_v58, %v618_v55  ;;  %v1064_v55 = vsel %vm1051_vm5, %v1061_v48, %v1063_v54 }
  0x3c   : > { %3827 = vmatprep.mubr.msk.bf16.mxu0 %vm4591_vm0, %v6033_v1 }
  0x3d   : > { %3852 = vmatmul.mubr.msk.bf16.gmra.mrb[8].mxu1 %vm415_vm1, %v651_v4  ;;  %v4919_v4 = vsel %vm1566_vm6, %v4894_v52, %v4910_v0  ;;  %v627_v6 = vsel %vm567_vm2, %v622_v2, %v626_v30  ;;  %v4460_v30 = vld [vmem:[%s6026_s2 + $0x38] sm:$0xff]   ;;  %v1069_v2 = vrot.slane %v4740_v28, 1 }
  0x3e   : > { %3855 = vmatprep.mubr.msk.bf16.mxu1 %vm4591_vm0, %v6033_v1 }
  0x43   : > { %3828 = vmatmul.mubr.msk.bf16.gmra.mrb[12].mxu0 %vm415_vm1, %v603_v16  ;;  %v1053_v16 = vrot.slane %v4707_v14, 1 }
  0x44   : > { %3831 = vmatprep.mubr.msk.bf16.mxu0 %vm4591_vm0, %v6033_v1 }
  0x45   : > { %3856 = vmatmul.mubr.msk.bf16.gmra.mrb[12].mxu1 %vm415_vm1, %v659_v22  ;;  %v1054_v22 = vsel %vm1051_vm5, %v1052_v10, %v1053_v16  ;;  %v1074_v10 = vsel %vm1051_vm5, %v1071_v7, %v1073_v21 }
  0x46   : > { %3859 = vmatprep.mubr.msk.bf16.mxu1 %vm4591_vm0, %v6033_v1 }
  0x4b   : > { %3832 = vmatmul.mubr.msk.bf16.gmra.mrb[16].mxu0 %vm415_vm1, %v611_v42  ;;  %v1059_v42 = vrot.slane %v4803_v56, 1 }
  0x4c   : > { %3835 = vmatprep.mubr.msk.bf16.mxu0 %vm4591_vm0, %v6033_v1 }
  0x4d   : > { %3860 = vmatmul.mubr.msk.bf16.gmra.mrb[16].mxu1 %vm415_vm1, %v667_v49  ;;  %v1060_v47 = vsel %vm1051_vm5, %v1057_v40, %v1059_v42  ;;  %v1062_v49 = vsel %vm1051_vm5, %v1059_v42, %v1061_v48  ;;  %v1325_v42 = vrot.slane %v4732_v25, 5 }
  0x4e   : > { %3863 = vmatprep.mubr.msk.bf16.mxu1 %vm4591_vm0, %v6033_v1 }
  0x53   : > { %3836 = vmatmul.mubr.msk.bf16.gmra.mrb[20].mxu0 %vm415_vm1, %v619_v17  ;;  %v1066_v17 = vsel %vm1051_vm5, %v1063_v54, %v1065_v31  ;;  %v1596_v54 = vrot.slane %v4828_v3, 5 }
  0x54   : > { %3839 = vmatprep.mubr.msk.bf16.mxu0 %vm4591_vm0, %v6033_v1 }
  0x55   : > { %3864 = vmatmul.mubr.msk.bf16.gmra.mrb[20].mxu1 %vm415_vm1, %v670_v61  ;;  %v4466_v61 = vld [vmem:[%s4722_s20 + $0x4] sm:$0xff]   ;;  %s4319_s20 = smul.u32 100, %s268_s14 }
  0x56   : > { %3871 = vmatprep.mubr.msk.bf16.mxu1 %vm4591_vm0, %v6033_v1  ;;  %533 = vst.msk [vmem:[#allocation2 + $0x68] sm:$0xff] %vm415_vm1, %v4466_v61  ;;  %v1605_v61 = vrot.slane %v4850_v12, 5 }
  0x57   : > { %s5807_s15 = scalar_lea.vmem [#allocation3], %s4319_s20  }
  0x5b   : > { %3840 = vmatmul.mubr.msk.bf16.gmra.mrb[24].mxu0 %vm415_vm1, %v627_v6  ;;  %v1070_v6 = vsel %vm1051_vm5, %v1067_v59, %v1069_v2  ;;  %v1329_v59 = vrot.slane %v4803_v56, 5 }
  0x5c   : > { %3927 = vmatprep.mubr.msk.bf16.mxu0 %vm4591_vm0, %v6033_v1 }
  0x5d   : > { %3872 = vmatmul.mubr.msk.bf16.vlgmr.msra.gmra.mrb[24].mxu1 %vm415_vm1, %v4705_v13  ;;  %v1055_v13 = vrot.slane %v4732_v25, 1 }
  0x5e   : > { %3980 = vmatpush3.bf16.msra.mxu1 %v4458_v9  ;;  %3875 = vmatprep.mubr.msk.bf16.mxu1 %vm4591_vm0, %v6033_v1  ;;  %v1072_v9 = vsel %vm1051_vm5, %v1069_v2, %v1071_v7  ;;  %v1608_v2 = vrot.slane %v4819_v62, 6  ;;  %v1331_v7 = vrot.slane %v4838_v8, 5 }
  0x5f   : > { %3981 = vmatprep.subr.bf16.mxu1 %v6033_v1  ;;  %v1056_v35 = vsel %vm1051_vm5, %v1053_v16, %v1055_v13  ;;  %v1058_v41 = vsel %vm1051_vm5, %v1055_v13, %v1057_v40  ;;  %v557_v16 = vld [vmem:[#allocation2 + $0x60] sm:$0xf]  ;;  %v1323_v13 = vrot.slane %v4707_v14, 5 }
  0x61   : > { %v1326_v48 = vsel %vm1321_vm7, %v1323_v13, %v1325_v42 }
  0x62   : > { %3982 = vmatpush3.bf16.msra.mxu1 %v4460_v30  ;;  %v1289_v30 = vld [vmem:[#allocation2] sm:$0xe0] }
  0x63   : > { %3928 = vmatmul.mubr.msk.bf16.vlgmr.msra.gmra.mrb[28].mxu0 %vm415_vm1, %v1054_v22  ;;  %4091 = vmatprep.subr.bf16.mxu1 %v6033_v1  ;;  %v1568_v21 = vshrl.u32 %v1289_v30, 16  ;;  %v1571_v22 = vshll.u32 %v1289_v30, 16 }
  0x64   : > { %4036 = vmatpush3.bf16.msra.mxu0 %v4459_v29  ;;  %3931 = vmatprep.mubr.msk.bf16.mxu0 %vm4591_vm0, %v6033_v1  ;;  %v1322_v29 = vrot.slane %v1289_v30, 5 }
  0x65   : > { %3876 = vmatmul.mubr.msk.bf16.gmra.mrb[28].mxu1 %vm415_vm1, %v4707_v14  ;;  %4037 = vmatprep.subr.bf16.mxu0 %v6033_v1 }
  0x66   : > { %3879 = vmatprep.mubr.msk.bf16.mxu1 %vm4591_vm0, %v6033_v1  ;;  %v1324_v40 = vsel %vm1321_vm7, %v1322_v29, %v1323_v13  ;;  %v1623_v29 = vrot.slane %v4906_v58, 5  ;;  %v1626_v13 = vrot.slane %v4886_v44, 6 }
  0x68   : > { %4038 = vmatpush3.bf16.msra.mxu0 %v4461_v34  ;;  %v1570_v34 = vrot.slane %v1568_v21, 5  ;;  %v1333_v21 = vrot.slane %v4876_v36, 5 }
  0x69   : > { %4147 = vmatprep.subr.bf16.mxu0 %v6033_v1 }
  0x6b   : > { %3932 = vmatmul.mubr.msk.bf16.gmra.mrb[32].mxu0 %vm415_vm1, %v1056_v35  ;;  %v1573_v35 = vrot.slane %v1571_v22, 6 }
  0x6c   : > { %3935 = vmatprep.mubr.msk.bf16.mxu0 %vm4591_vm0, %v6033_v1 }
  0x6d   : > { %3880 = vmatmul.mubr.msk.bf16.gmra.mrb[32].mxu1 %vm415_vm1, %v4732_v25 }
  0x6e   : > { %3883 = vmatprep.mubr.msk.bf16.mxu1 %vm4591_vm0, %v6033_v1 }
  0x73   : > { %3936 = vmatmul.mubr.msk.bf16.gmra.mrb[36].mxu0 %vm415_vm1, %v1058_v41  ;;  %v1574_v41 = vor.u32 %v1573_v35, %v1570_v34  ;;  %v1334_v34 = vsel %vm1321_vm7, %v1331_v7, %v1333_v21  ;;  %v1627_v35 = vor.u32 %v1626_v13, %v1623_v29  ;;  %v1659_v13 = vrot.slane %v4833_v5, 5 }
  0x74   : > { %3939 = vmatprep.mubr.msk.bf16.mxu0 %vm4591_vm0, %v6033_v1 }
  0x75   : > { %3884 = vmatmul.mubr.msk.bf16.gmra.mrb[36].mxu1 %vm415_vm1, %v4762_v39  ;;  %v1583_v11 = vsel %vm1566_vm6, %v1574_v41, %v4894_v52  ;;  %v1327_v52 = vrot.slane %v4762_v39, 5  ;;  %v1632_v41 = vrot.slane %v4730_v24, 5 }
  0x76   : > { %3887 = vmatprep.mubr.msk.bf16.mxu1 %vm4591_vm0, %v6033_v1 }
  0x77   : > { %v1328_v31 = vsel %vm1321_vm7, %v1325_v42, %v1327_v52  ;;  %v1635_v42 = vrot.slane %v4727_v23, 6 }
  0x7b   : > { %3940 = vmatmul.mubr.msk.bf16.gmra.mrb[40].mxu0 %vm415_vm1, %v1060_v47  ;;  %v4464_v47 = vld [vmem:[%s6026_s2 + $0x58] sm:$0xff]  }
  0x7c   : > { %3943 = vmatprep.mubr.msk.bf16.mxu0 %vm4591_vm0, %v6033_v1 }
  0x7d   : > { %3888 = vmatmul.mubr.msk.bf16.gmra.mrb[40].mxu1 %vm415_vm1, %v4803_v56 }
  0x7e   : > { %3891 = vmatprep.mubr.msk.bf16.mxu1 %vm4591_vm0, %v6033_v1 }
  0x83   : > { %3944 = vmatmul.mubr.msk.bf16.gmra.mrb[44].mxu0 %vm415_vm1, %v1062_v49  ;;  %v4465_v49 = vld [vmem:[%s6026_s2 + $0x68] sm:$0xff]  }
  0x84   : > { %3947 = vmatprep.mubr.msk.bf16.mxu0 %vm4591_vm0, %v6033_v1 }
  0x85   : > { %3892 = vmatmul.mubr.msk.bf16.gmra.mrb[44].mxu1 %vm415_vm1, %v4838_v8 }
  0x86   : > { %3895 = vmatprep.mubr.msk.bf16.mxu1 %vm4591_vm0, %v6033_v1 }
  0x8b   : > { %3948 = vmatmul.mubr.msk.bf16.gmra.mrb[48].mxu0 %vm415_vm1, %v1064_v55  ;;  %v1599_v55 = vrot.slane %v4777_v45, 6 }
  0x8c   : > { %3951 = vmatprep.mubr.msk.bf16.mxu0 %vm4591_vm0, %v6033_v1 }
  0x8d   : > { %3896 = vmatmul.mubr.msk.bf16.gmra.mrb[48].mxu1 %vm415_vm1, %v4876_v36 }
  0x8e   : > { %3899 = vmatprep.mubr.msk.bf16.mxu1 %vm4591_vm0, %v6033_v1 }
  0x93   : > { %3952 = vmatmul.mubr.msk.bf16.gmra.mrb[52].mxu0 %vm415_vm1, %v1066_v17  ;;  %v1600_v17 = vor.u32 %v1599_v55, %v1596_v54 }
  0x94   : > { %3955 = vmatprep.mubr.msk.bf16.mxu0 %vm4591_vm0, %v6033_v1 }
  0x95   : > { %3900 = vmatmul.mubr.msk.bf16.gmra.mrb[52].mxu1 %vm415_vm1, %v4714_v18 }
  0x96   : > { %3903 = vmatprep.mubr.msk.bf16.mxu1 %vm4591_vm0, %v6033_v1 }
  0x9b   : > { %3956 = vmatmul.mubr.msk.bf16.gmra.mrb[56].mxu0 %vm415_vm1, %v1068_v60  ;;  %v1601_v60 = vsel %vm1566_vm6, %v4910_v0, %v1600_v17 }
  0x9c   : > { %3959 = vmatprep.mubr.msk.bf16.mxu0 %vm4591_vm0, %v6033_v1 }
  0x9d   : > { %3904 = vmatmul.mubr.msk.bf16.gmra.mrb[56].mxu1 %vm415_vm1, %v4716_v19 }
  0x9e   : > { %3907 = vmatprep.mubr.msk.bf16.mxu1 %vm4591_vm0, %v6033_v1 }
  0xa3   : > { %3960 = vmatmul.mubr.msk.bf16.gmra.mrb[60].mxu0 %vm415_vm1, %v1070_v6  ;;  %v1609_v6 = vor.u32 %v1608_v2, %v1605_v61  ;;  %v1650_v61 = vrot.slane %v4793_v51, 5  ;;  %v1653_v2 = vrot.slane %v4760_v38, 6 }
  0xa4   : > { %3963 = vmatprep.mubr.msk.bf16.mxu0 %vm4591_vm0, %v6033_v1 }
  0xa5   : > { %3908 = vmatmul.mubr.msk.bf16.gmra.mrb[60].mxu1 %vm415_vm1, %v4740_v28  ;;  %v1610_v0 = vsel %vm1566_vm6, %v1600_v17, %v1609_v6 }
  0xa6   : > { %3911 = vmatprep.mubr.msk.bf16.mxu1 %vm4591_vm0, %v6033_v1 }
  0xab   : > { %3964 = vmatmul.mubr.msk.bf16.gmra.mrb[64].mxu0 %vm415_vm1, %v1072_v9  ;;  %v1614_v9 = vrot.slane %v4883_v43, 5 }
  0xac   : > { %3967 = vmatprep.mubr.msk.bf16.mxu0 %vm4591_vm0, %v6033_v1 }
  0xad   : > { %3912 = vmatmul.mubr.msk.bf16.gmra.mrb[64].mxu1 %vm415_vm1, %v4779_v46 }
  0xae   : > { %3915 = vmatprep.mubr.msk.bf16.mxu1 %vm4591_vm0, %v6033_v1 }
  0xb3   : > { %3968 = vmatmul.mubr.msk.bf16.gmra.mrb[68].mxu0 %vm415_vm1, %v1074_v10  ;;  %v1617_v10 = vrot.slane %v4855_v20, 6 }
  0xb4   : > { %3971 = vmatprep.mubr.msk.bf16.mxu0 %vm4591_vm0, %v6033_v1 }
  0xb5   : > { %3916 = vmatmul.mubr.msk.bf16.gmra.mrb[68].mxu1 %vm415_vm1, %v4805_v57  ;;  %v1618_v30 = vor.u32 %v1617_v10, %v1614_v9  ;;  %v1654_v9 = vor.u32 %v1653_v2, %v1650_v61 }
  0xb6   : > { %3919 = vmatprep.mubr.msk.bf16.mxu1 %vm4591_vm0, %v6033_v1 }
  0xb7   : > { %v1619_v22 = vsel %vm1566_vm6, %v1609_v6, %v1618_v30 }
  0xbb   : > { %3972 = vmatmul.mubr.msk.bf16.gmra.mrb[72].mxu0 %vm415_vm1, %v4868_v33  ;;  %v4462_v33 = vld [vmem:[%s6026_s2 + $0x50] sm:$0xff]  }
  0xbc   : > { %3975 = vmatprep.mubr.msk.bf16.mxu0 %vm4591_vm0, %v6033_v1 }
  0xbd   : > { %3920 = vmatmul.mubr.msk.bf16.gmra.mrb[72].mxu1 %vm415_vm1, %v557_v16  ;;  %v1332_v16 = vsel %vm1321_vm7, %v1329_v59, %v1331_v7 }
  0xbe   : > { %3983 = vmatprep.mubr.msk.bf16.mxu1 %vm4591_vm0, %v6033_v1 }
  0xc3   : > { %3976 = vmatmul.mubr.msk.bf16.gmra.mrb[76].mxu0 %vm415_vm1, %v1075_v15  ;;  %v4463_v15 = vld [vmem:[%s6026_s2 + $0x60] sm:$0xff]  }
  0xc4   : > { %4039 = vmatprep.mubr.msk.bf16.mxu0 %vm4591_vm0, %v6033_v1 }
  0xc5   : > { %3984 = vmatmul.mubr.msk.bf16.vlgmr.msra.gmra.mrb[76].mxu1 %vm415_vm1, %v1324_v40  ;;  %v1335_v40 = vrot.slane %v4714_v18, 5  ;;  %v1337_v18 = vrot.slane %v4716_v19, 5  ;;  %v1339_v19 = vrot.slane %v4740_v28, 5 }
  0xc6   : > { %4092 = vmatpush3.bf16.msra.mxu1 %v4462_v33  ;;  %3987 = vmatprep.mubr.msk.bf16.mxu1 %vm4591_vm0, %v6033_v1  ;;  %v1628_v33 = vsel %vm1566_vm6, %v1618_v30, %v1627_v35 }
  0xc7   : > { %4093 = vmatprep.subr.bf16.mxu1 %v6033_v1 }
  0xca   : > { %4094 = vmatpush3.bf16.msra.mxu1 %v4464_v47  ;;  %v1336_v47 = vsel %vm1321_vm7, %v1333_v21, %v1335_v40 }
  0xcb   : > { %4040 = vmatmul.mubr.msk.bf16.vlgmr.msra.gmra.mrb[80].mxu0 %vm415_vm1, %v1583_v11  ;;  %4203 = vmatprep.subr.bf16.mxu1 %v6033_v1  ;;  %v1636_v11 = vor.u32 %v1635_v42, %v1632_v41 }
  0xcc   : > { %4148 = vmatpush3.bf16.msra.mxu0 %v4463_v15  ;;  %4043 = vmatprep.mubr.msk.bf16.mxu0 %vm4591_vm0, %v6033_v1 }
  0xcd   : > { %3988 = vmatmul.mubr.msk.bf16.gmra.mrb[80].mxu1 %vm415_vm1, %v1326_v48  ;;  %4149 = vmatprep.subr.bf16.mxu0 %v6033_v1  ;;  %v1637_v15 = vsel %vm1566_vm6, %v1627_v35, %v1636_v11  ;;  %v1641_v48 = vrot.slane %v4757_v37, 5 }
  0xce   : > { %3991 = vmatprep.mubr.msk.bf16.mxu1 %vm4591_vm0, %v6033_v1 }
  0xd0   : > { %4150 = vmatpush3.bf16.msra.mxu0 %v4465_v49  ;;  %v1644_v49 = vrot.slane %v4735_v26, 6 }
  0xd1   : > { %4259 = vmatprep.subr.bf16.mxu0 %v6033_v1 }
  0xd2   : > { %v1645_v54 = vor.u32 %v1644_v49, %v1641_v48 }
  0xd3   : > { %4044 = vmatmul.mubr.msk.bf16.gmra.mrb[84].mxu0 %vm415_vm1, %v4919_v4  ;;  %v1330_v4 = vsel %vm1321_vm7, %v1327_v52, %v1329_v59  ;;  %v1338_v52 = vsel %vm1321_vm7, %v1335_v40, %v1337_v18 }
  0xd4   : > { %4047 = vmatprep.mubr.msk.bf16.mxu0 %vm4591_vm0, %v6033_v1  ;;  %v1655_v29 = vsel %vm1566_vm6, %v1645_v54, %v1654_v9 }
  0xd5   : > { %3992 = vmatmul.mubr.msk.bf16.gmra.mrb[84].mxu1 %vm415_vm1, %v1328_v31 }
  0xd6   : > { %3995 = vmatprep.mubr.msk.bf16.mxu1 %vm4591_vm0, %v6033_v1 }
  0xdb   : > { %4048 = vmatmul.mubr.msk.bf16.gmra.mrb[88].mxu0 %vm415_vm1, %v1601_v60  ;;  %v1646_v60 = vsel %vm1566_vm6, %v1636_v11, %v1645_v54  ;;  %v2412_v11 = vrot.slane %v4746_v32, 3 }
  0xdc   : > { %4051 = vmatprep.mubr.msk.bf16.mxu0 %vm4591_vm0, %v6033_v1 }
  0xdd   : > { %3996 = vmatmul.mubr.msk.bf16.gmra.mrb[88].mxu1 %vm415_vm1, %v1330_v4 }
  0xde   : > { %3999 = vmatprep.mubr.msk.bf16.mxu1 %vm4591_vm0, %v6033_v1 }
  0xe3   : > { %4052 = vmatmul.mubr.msk.bf16.gmra.mrb[92].mxu0 %vm415_vm1, %v1610_v0  ;;  %v1340_v0 = vsel %vm1321_vm7, %v1337_v18, %v1339_v19 }
  0xe4   : > { %4055 = vmatprep.mubr.msk.bf16.mxu0 %vm4591_vm0, %v6033_v1 }
  0xe5   : > { %4000 = vmatmul.mubr.msk.bf16.gmra.mrb[92].mxu1 %vm415_vm1, %v1332_v16  ;;  %v1341_v16 = vrot.slane %v4779_v46, 5 }
  0xe6   : > { %4003 = vmatprep.mubr.msk.bf16.mxu1 %vm4591_vm0, %v6033_v1 }
  0xe7   : > { %v1342_v41 = vsel %vm1321_vm7, %v1339_v19, %v1341_v16  ;;  %v1668_v19 = vrot.slane %v4860_v27, 5 }
  0xeb   : > { %4056 = vmatmul.mubr.msk.bf16.gmra.mrb[96].mxu0 %vm415_vm1, %v1619_v22 }
  0xec   : > { %4059 = vmatprep.mubr.msk.bf16.mxu0 %vm4591_vm0, %v6033_v1 }
  0xed   : > { %4004 = vmatmul.mubr.msk.bf16.gmra.mrb[96].mxu1 %vm415_vm1, %v1334_v34  ;;  %v1662_v34 = vrot.slane %v4798_v53, 6  ;;  %v6047_v53 = vmov 0.0  }
  0xee   : > { %4007 = vmatprep.mubr.msk.bf16.mxu1 %vm4591_vm0, %v6033_v1 }
  0xef   : > { %v1663_v42 = vor.u32 %v1662_v34, %v1659_v13 }
  0xf1   : > { %v1664_v54 = vsel %vm1566_vm6, %v1654_v9, %v1663_v42 }
  0xf3   : > { %4060 = vmatmul.mubr.msk.bf16.gmra.mrb[100].mxu0 %vm415_vm1, %v1628_v33 }
  0xf4   : > { %4063 = vmatprep.mubr.msk.bf16.mxu0 %vm4591_vm0, %v6033_v1 }
  0xf5   : > { %4008 = vmatmul.mubr.msk.bf16.gmra.mrb[100].mxu1 %vm415_vm1, %v1336_v47  ;;  %v2411_v47 = vrot.slane %v4790_v50, 2  ;;  %v1671_v50 = vrot.slane %v4822_v63, 6 }
  0xf6   : > { %4011 = vmatprep.mubr.msk.bf16.mxu1 %vm4591_vm0, %v6033_v1 }
  0xf7   : > { %v5215_v2 = vor.u32 %v2412_v11, %v2411_v47  ;;  %v5239_v47 = vld [vmem:[#allocation2 + $0x68] sm:$0x3] }
  0xfb   : > { %4064 = vmatmul.mubr.msk.bf16.gmra.mrb[104].mxu0 %vm415_vm1, %v1637_v15  ;;  %v1343_v15 = vrot.slane %v4805_v57, 5 }
  0xfc   : > { %4067 = vmatprep.mubr.msk.bf16.mxu0 %vm4591_vm0, %v6033_v1 }
  0xfd   : > { %4012 = vmatmul.mubr.msk.bf16.gmra.mrb[104].mxu1 %vm415_vm1, %v1338_v52  ;;  %v1344_v61 = vsel %vm1321_vm7, %v1341_v16, %v1343_v15 }
  0xfe   : > { %v5160_v55 = vpop.f32.mrb[0].mxu0  ;;  %4015 = vmatprep.mubr.msk.bf16.mxu1 %vm4591_vm0, %v6033_v1 }
  0xff   : > { %v3817_v31 = vpop.f32.mrb[1].mxu0 }
 0x100   : > { %v5165_v17 = vpop.f32.mrb[2].mxu0  ;;  %v5167_v59 = vpop.f32.mrb[0].mxu1 }
 0x101   : > { %v3818_v4 = vpop.f32.mrb[3].mxu0  ;;  %v3845_v6 = vpop.f32.mrb[1].mxu1 }
 0x102   : > { %v5172_v7 = vpop.f32.mrb[2].mxu1  ;;  %v5218_v4 = vld [vmem:[#allocation2 + $0x60] sm:$0xff]  ;;  %v1672_v6 = vor.u32 %v1671_v50, %v1668_v19  ;;  %v1302_v19 = vld [vmem:[#allocation2 + $0x68] sm:$0x1]  ;;  %v1684_v50 = vshrl.u32 %v5239_v47, 16 }
 0x103   : > { %4068 = vmatmul.mubr.msk.bf16.gmra.mrb[108].mxu0 %vm415_vm1, %v1646_v60  ;;  %v3846_v28 = vpop.f32.mrb[3].mxu1  ;;  %v1345_v16 = vrot.slane %v5218_v4, 5 }
 0x104   : > { %4071 = vmatprep.mubr.msk.bf16.mxu0 %vm4591_vm0, %v6033_v1  ;;  %v6029_v28 = vshll.u32 %v5218_v4, 16  ;;  %v1673_v34 = vsel %vm1566_vm6, %v1663_v42, %v1672_v6 }
 0x105   : > { %4016 = vmatmul.mubr.msk.bf16.gmra.mrb[108].mxu1 %vm415_vm1, %v1340_v0  ;;  %v6030_v0 = vshrl.u32 %v5218_v4, 16 }
 0x106   : > { %v5179_v10 = vpop.f32.mrb[4].mxu0  ;;  %4019 = vmatprep.mubr.msk.bf16.mxu1 %vm4591_vm0, %v6033_v1 }
 0x107   : > { %v3821_v30 = vpop.f32.mrb[5].mxu0 }
 0x108   : > { %v5184_v21 = vpop.f32.mrb[6].mxu0  ;;  %v5186_v22 = vpop.f32.mrb[4].mxu1 }
 0x109   : > { %v3822_v35 = vpop.f32.mrb[7].mxu0  ;;  %v3849_v40 = vpop.f32.mrb[5].mxu1 }
 0x10a   : > { %v5191_v33 = vpop.f32.mrb[6].mxu1  ;;  %v1677_v35 = vrot.slane %v6030_v0, 5  ;;  %v1680_v40 = vrot.slane %v6029_v28, 6  ;;  %v1904_v0 = vld [vmem:[#allocation2] sm:$0xc0] }
 0x10b   : > { %4072 = vmatmul.mubr.msk.bf16.gmra.mrb[112].mxu0 %vm415_vm1, %v1655_v29  ;;  %v3850_v46 = vpop.f32.mrb[7].mxu1 }
 0x10c   : > { %4075 = vmatprep.mubr.msk.bf16.mxu0 %vm4591_vm0, %v6033_v1  ;;  %v1681_v42 = vor.u32 %v1680_v40, %v1677_v35  ;;  %v1686_v35 = vrot.slane %v1684_v50, 5  ;;  %v1913_v50 = vrot.slane %v4707_v14, 6 }
 0x10d   : > { %4020 = vmatmul.mubr.msk.bf16.gmra.mrb[112].mxu1 %vm415_vm1, %v1342_v41 }
 0x10e   : > { %v5200_v18 = vpop.f32.mrb[8].mxu0  ;;  %4023 = vmatprep.mubr.msk.bf16.mxu1 %vm4591_vm0, %v6033_v1 }
 0x10f   : > { %v3825_v48 = vpop.f32.mrb[9].mxu0 }
 0x110   : > { %v5205_v49 = vpop.f32.mrb[10].mxu0  ;;  %v5207_v52 = vpop.f32.mrb[8].mxu1  ;;  %v1346_v48 = vsel %vm1321_vm7, %v1343_v15, %v1345_v16  ;;  %v1347_v15 = vrot.slane %v1302_v19, 5 }
 0x111   : > { %v3826_v31 = vpop.f32.mrb[11].mxu0  ;;  %v3853_v32 = vpop.f32.mrb[9].mxu1 }
 0x112   : > { %v5212_v60 = vpop.f32.mrb[10].mxu1  ;;  %v1687_v31 = vshll.u32 %v5239_v47, 16 }
 0x113   : > { %4076 = vmatmul.mubr.msk.bf16.gmra.mrb[116].mxu0 %vm415_vm1, %v1664_v54  ;;  %v3854_v57 = vpop.f32.mrb[11].mxu1 }
 0x114   : > { %4079 = vmatprep.mubr.msk.bf16.mxu0 %vm4591_vm0, %v6033_v1  ;;  %v1689_v40 = vrot.slane %v1687_v31, 6 }
 0x115   : > { %4024 = vmatmul.mubr.msk.bf16.gmra.mrb[116].mxu1 %vm415_vm1, %v1344_v61 }
 0x116   : > { %v5225_v9 = vpop.f32.mrb[12].mxu0  ;;  %4027 = vmatprep.mubr.msk.bf16.mxu1 %vm4591_vm0, %v6033_v1  ;;  %v1690_v19 = vor.u32 %v1689_v40, %v1686_v35  ;;  %v5276_v40 = vld [vmem:[#allocation2 + $0x8] sm:$0xfc] }
 0x117   : > { %v3829_v30 = vpop.f32.mrb[13].mxu0 }
 0x118   : > { %v5230_v29 = vpop.f32.mrb[14].mxu0  ;;  %v5232_v13 = vpop.f32.mrb[12].mxu1 }
 0x119   : > { %v3830_v41 = vpop.f32.mrb[15].mxu0  ;;  %v3857_v46 = vpop.f32.mrb[13].mxu1 }
 0x11a   : > { %v5241_v11 = vpop.f32.mrb[14].mxu1 }
 0x11b   : > { %4080 = vmatmul.mubr.msk.bf16.gmra.mrb[120].mxu0 %vm415_vm1, %v1673_v34  ;;  %v3858_v54 = vpop.f32.mrb[15].mxu1  ;;  %v1682_v34 = vsel %vm1566_vm6, %v1672_v6, %v1681_v42  ;;  %v1912_v6 = vrot.slane %v1904_v0, 6  ;;  %v4467_v0 = vld [vmem:[%s6026_s2 + $0x70] sm:$0xff]  }
 0x11c   : > { %4083 = vmatprep.mubr.msk.bf16.mxu0 %vm4591_vm0, %v6033_v1 }
 0x11d   : > { %4028 = vmatmul.mubr.msk.bf16.gmra.mrb[120].mxu1 %vm415_vm1, %v1346_v48  ;;  %v1348_v48 = vsel %vm1321_vm7, %v1345_v16, %v1347_v15  ;;  %v1691_v15 = vsel %vm1566_vm6, %v1681_v42, %v1690_v19  ;;  %v2161_v42 = vrot.slane %v4732_v25, 2 }
 0x11e   : > { %v5250_v32 = vpop.f32.mrb[16].mxu0  ;;  %4031 = vmatprep.mubr.msk.bf16.mxu1 %vm4591_vm0, %v6033_v1 }
 0x11f   : > { %v3833_v61 = vpop.f32.mrb[17].mxu0 }
 0x120   : > { %v5254_v57 = vpop.f32.mrb[18].mxu0  ;;  %v5256_v30 = vpop.f32.mrb[16].mxu1 }
 0x121   : > { %v3834_v41 = vpop.f32.mrb[19].mxu0  ;;  %v3861_v46 = vpop.f32.mrb[17].mxu1 }
 0x122   : > { %v5259_v54 = vpop.f32.mrb[18].mxu1  ;;  %v1914_v46 = vsel %vm1911_vm8, %v1912_v6, %v1913_v50  ;;  %v1915_v6 = vrot.slane %v4732_v25, 6 }
 0x123   : > { %4084 = vmatmul.mubr.msk.bf16.gmra.mrb[124].mxu0 %vm415_vm1, %v1682_v34  ;;  %v3862_v28 = vpop.f32.mrb[19].mxu1 }
 0x124   : > { %4087 = vmatprep.mubr.msk.bf16.mxu0 %vm4591_vm0, %v6033_v1  ;;  %v1916_v27 = vsel %vm1911_vm8, %v1913_v50, %v1915_v6 }
 0x125   : > { %4032 = vmatmul.mubr.msk.bf16.gmra.mrb[124].mxu1 %vm415_vm1, %v1348_v48  ;;  %v2160_v48 = vrot.slane %v5276_v40, 2 }
 0x126   : > { %v5266_v61 = vpop.f32.mrb[20].mxu0  ;;  %4095 = vmatprep.mubr.msk.bf16.mxu1 %vm4591_vm0, %v6033_v1 }
 0x127   : > { %v3837_v31 = vpop.f32.mrb[21].mxu0 }
 0x128   : > { %v5271_v16 = vpop.f32.mrb[22].mxu0  ;;  %v5273_v28 = vpop.f32.mrb[20].mxu1  ;;  %v4469_v31 = vld [vmem:[%s6026_s2 + $0x78] sm:$0xff]  }
 0x129   : > { %v3838_v34 = vpop.f32.mrb[23].mxu0  ;;  %v3865_v35 = vpop.f32.mrb[21].mxu1 }
 0x12a   : > { %v855_v41 = vpop.f32.mrb[22].mxu1 }
 0x12b   : > { %4088 = vmatmul.mubr.msk.bf16.gmra.mrb[128].mxu0 %vm415_vm1, %v1691_v15  ;;  %v3866_v14 = vpop.f32.mrb[23].mxu1  ;;  %v2162_v41 = vsel %vm2159_vm9, %v2160_v48, %v2161_v42  ;;  %v2163_v48 = vrot.slane %v4762_v39, 2 }
 0x12c   : > { %4151 = vmatprep.mubr.msk.bf16.mxu0 %vm4591_vm0, %v6033_v1 }
 0x12d   : > { %4096 = vmatmul.mubr.msk.bf16.vlgmr.msra.gmra.mrb[128].mxu1 %vm415_vm1, %v1914_v46  ;;  %v4468_v46 = vld [vmem:[%s6026_s2 + $0x80] sm:$0xff]  }
 0x12e   : > { %v5288_v19 = vpop.f32.mrb[24].mxu0  ;;  %4204 = vmatpush3.bf16.msra.mxu1 %v4467_v0  ;;  %4099 = vmatprep.mubr.msk.bf16.mxu1 %vm4591_vm0, %v6033_v1 }
 0x12f   : > { %v3841_v15 = vpop.f32.mrb[25].mxu0  ;;  %4205 = vmatprep.subr.bf16.mxu1 %v6033_v1 }
 0x130   : > { %v931_v34 = vpop.f32.mrb[24].mxu1  ;;  %v5297_v35 = vpop.f32.mrb[26].mxu0 }
 0x131   : > { %v932_v0 = vadd.f32 %v931_v34, %v5160_v55  ;;  %v3873_v14 = vpop.f32.mrb[25].mxu1  ;;  %v3842_v25 = vpop.f32.mrb[27].mxu0  ;;  %v4470_v55 = vld [vmem:[%s6026_s2 + $0x88] sm:$0xff]  }
 0x132   : > { %v934_v63 = vpop.f32.mrb[26].mxu1  ;;  %4206 = vmatpush3.bf16.msra.mxu1 %v4469_v31 }
 0x133   : > { %v935_v15 = vadd.f32 %v934_v63, %v5165_v17  ;;  %4152 = vmatmul.mubr.msk.bf16.vlgmr.msra.gmra.mrb[132].mxu0 %vm415_vm1, %v2162_v41  ;;  %v3874_v1 = vpop.f32.mrb[27].mxu1  ;;  %v2164_v41 = vsel %vm2159_vm9, %v2161_v42, %v2163_v48  ;;  %v2165_v42 = vrot.slane %v4803_v56, 2 }
 0x134   : > { %4260 = vmatpush3.bf16.msra.mxu0 %v4468_v46  ;;  %4155 = vmatprep.mubr.msk.bf16.mxu0 %vm4591_vm0, %v6047_v53  ;;  %v1917_v1 = vrot.slane %v4762_v39, 6 }
 0x135   : > { %4100 = vmatmul.mubr.msk.bf16.gmra.mrb[132].mxu1 %vm415_vm1, %v1916_v27  ;;  %4261 = vmatprep.subr.bf16.mxu0 %v6047_v53 }
 0x136   : > { %v1162_v50 = vpop.f32.mrb[28].mxu0  ;;  %4103 = vmatprep.mubr.msk.bf16.mxu1 %vm4591_vm0, %v6047_v53  ;;  %v1918_v38 = vsel %vm1911_vm8, %v1915_v6, %v1917_v1 }
 0x137   : > { %v5318_v63 = vadd.f32 %v1162_v50, %v932_v0  ;;  %v3929_v17 = vpop.f32.mrb[29].mxu0  ;;  %v1919_v0 = vrot.slane %v4803_v56, 6 }
 0x138   : > { %v939_v31 = vpop.f32.mrb[28].mxu1  ;;  %v1165_v34 = vpop.f32.mrb[30].mxu0  ;;  %4262 = vmatpush3.bf16.msra.mxu0 %v4470_v55  ;;  %v2166_v55 = vsel %vm2159_vm9, %v2163_v48, %v2165_v42 }
 0x139   : > { %v940_v46 = vadd.f32 %v939_v31, %v5179_v10  ;;  %v3877_v14 = vpop.f32.mrb[29].mxu1  ;;  %v5322_v27 = vadd.f32 %v1165_v34, %v935_v15  ;;  %v3930_v25 = vpop.f32.mrb[31].mxu0 }
 0x13a   : > { %v942_v5 = vpop.f32.mrb[30].mxu1 }
 0x13b   : > { %v943_v51 = vadd.f32 %v942_v5, %v5184_v21  ;;  %4156 = vmatmul.mubr.msk.bf16.gmra.mrb[136].mxu0 %vm415_vm1, %v2164_v41  ;;  %v3878_v39 = vpop.f32.mrb[31].mxu1  ;;  %v1920_v41 = vsel %vm1911_vm8, %v1917_v1, %v1919_v0 }
 0x13c   : > { %4159 = vmatprep.mubr.msk.bf16.mxu0 %vm4591_vm0, %v6047_v53 }
 0x13d   : > { %4104 = vmatmul.mubr.msk.bf16.gmra.mrb[136].mxu1 %vm415_vm1, %v1918_v38 }
 0x13e   : > { %v1170_v10 = vpop.f32.mrb[32].mxu0  ;;  %4107 = vmatprep.mubr.msk.bf16.mxu1 %vm4591_vm0, %v6047_v53 }
 0x13f   : > { %v5334_v15 = vadd.f32 %v1170_v10, %v940_v46  ;;  %v3933_v6 = vpop.f32.mrb[33].mxu0  ;;  %v2167_v46 = vrot.slane %v4838_v8, 2 }
 0x140   : > { %v947_v5 = vpop.f32.mrb[32].mxu1  ;;  %v1173_v21 = vpop.f32.mrb[34].mxu0 }
 0x141   : > { %v948_v50 = vadd.f32 %v947_v5, %v5200_v18  ;;  %v3881_v17 = vpop.f32.mrb[33].mxu1  ;;  %v5338_v31 = vadd.f32 %v1173_v21, %v943_v51  ;;  %v3934_v34 = vpop.f32.mrb[35].mxu0  ;;  %v1921_v51 = vrot.slane %v4838_v8, 6  ;;  %v2168_v39 = vsel %vm2159_vm9, %v2165_v42, %v2167_v46 }
 0x142   : > { %v950_v38 = vpop.f32.mrb[34].mxu1  ;;  %v1923_v42 = vrot.slane %v4876_v36, 6 }
 0x143   : > { %v951_v14 = vadd.f32 %v950_v38, %v5205_v49  ;;  %4160 = vmatmul.mubr.msk.bf16.gmra.mrb[140].mxu0 %vm415_vm1, %v2166_v55  ;;  %v3882_v56 = vpop.f32.mrb[35].mxu1  ;;  %v1922_v17 = vsel %vm1911_vm8, %v1919_v0, %v1921_v51 }
 0x144   : > { %4163 = vmatprep.mubr.msk.bf16.mxu0 %vm4591_vm0, %v6047_v53 }
 0x145   : > { %4108 = vmatmul.mubr.msk.bf16.gmra.mrb[140].mxu1 %vm415_vm1, %v1920_v41 }
 0x146   : > { %v1178_v18 = vpop.f32.mrb[36].mxu0  ;;  %4111 = vmatprep.mubr.msk.bf16.mxu1 %vm4591_vm0, %v6047_v53 }
 0x147   : > { %v5350_v48 = vadd.f32 %v1178_v18, %v948_v50  ;;  %v3937_v1 = vpop.f32.mrb[37].mxu0  ;;  %v2169_v50 = vrot.slane %v4876_v36, 2 }
 0x148   : > { %v955_v49 = vpop.f32.mrb[36].mxu1  ;;  %v1181_v25 = vpop.f32.mrb[38].mxu0 }
 0x149   : > { %v956_v10 = vadd.f32 %v955_v49, %v5225_v9  ;;  %v3885_v6 = vpop.f32.mrb[37].mxu1  ;;  %v5354_v5 = vadd.f32 %v1181_v25, %v951_v14  ;;  %v3938_v21 = vpop.f32.mrb[39].mxu0  ;;  %v2170_v14 = vsel %vm2159_vm9, %v2167_v46, %v2169_v50 }
 0x14a   : > { %v958_v55 = vpop.f32.mrb[38].mxu1 }
 0x14b   : > { %v959_v34 = vadd.f32 %v958_v55, %v5230_v29  ;;  %4164 = vmatmul.mubr.msk.bf16.gmra.mrb[144].mxu0 %vm415_vm1, %v2168_v39  ;;  %v3886_v8 = vpop.f32.mrb[39].mxu1  ;;  %v1924_v39 = vsel %vm1911_vm8, %v1921_v51, %v1923_v42 }
 0x14c   : > { %4167 = vmatprep.mubr.msk.bf16.mxu0 %vm4591_vm0, %v6047_v53 }
 0x14d   : > { %4112 = vmatmul.mubr.msk.bf16.gmra.mrb[144].mxu1 %vm415_vm1, %v1922_v17 }
 0x14e   : > { %v1186_v9 = vpop.f32.mrb[40].mxu0  ;;  %4115 = vmatprep.mubr.msk.bf16.mxu1 %vm4591_vm0, %v6047_v53 }
 0x14f   : > { %v5366_v38 = vadd.f32 %v1186_v9, %v956_v10  ;;  %v3941_v0 = vpop.f32.mrb[41].mxu0  ;;  %v5377_v10 = vld [vmem:[#allocation2 + $0x38] sm:$0xff] }
 0x150   : > { %v963_v29 = vpop.f32.mrb[40].mxu1  ;;  %v1189_v41 = vpop.f32.mrb[42].mxu0  ;;  %v2171_v46 = vrot.slane %v5377_v10, 2  ;;  %v1925_v51 = vrot.slane %v5377_v10, 6 }
 0x151   : > { %v964_v56 = vadd.f32 %v963_v29, %v5250_v32  ;;  %v3889_v18 = vpop.f32.mrb[41].mxu1  ;;  %v5370_v1 = vadd.f32 %v1189_v41, %v959_v34  ;;  %v3942_v49 = vpop.f32.mrb[43].mxu0 }
 0x152   : > { %v966_v25 = vpop.f32.mrb[42].mxu1  ;;  %v2172_v34 = vsel %vm2159_vm9, %v2169_v50, %v2171_v46  ;;  %v5395_v49 = vld [vmem:[#allocation2 + $0x40] sm:$0xff] }
 0x153   : > { %v967_v6 = vadd.f32 %v966_v25, %v5254_v57  ;;  %4168 = vmatmul.mubr.msk.bf16.gmra.mrb[148].mxu0 %vm415_vm1, %v2170_v14  ;;  %v3890_v36 = vpop.f32.mrb[43].mxu1  ;;  %v1926_v14 = vsel %vm1911_vm8, %v1923_v42, %v1925_v51  ;;  %v2173_v50 = vrot.slane %v5395_v49, 2  ;;  %v1927_v42 = vrot.slane %v5395_v49, 6 }
 0x154   : > { %4171 = vmatprep.mubr.msk.bf16.mxu0 %vm4591_vm0, %v6047_v53 }
 0x155   : > { %4116 = vmatmul.mubr.msk.bf16.gmra.mrb[148].mxu1 %vm415_vm1, %v1924_v39  ;;  %v2174_v36 = vsel %vm2159_vm9, %v2171_v46, %v2173_v50 }
 0x156   : > { %v1194_v32 = vpop.f32.mrb[44].mxu0  ;;  %4119 = vmatprep.mubr.msk.bf16.mxu1 %vm4591_vm0, %v6047_v53 }
 0x157   : > { %v5384_v21 = vadd.f32 %v1194_v32, %v964_v56  ;;  %v3945_v57 = vpop.f32.mrb[45].mxu0 }
 0x158   : > { %v971_v55 = vpop.f32.mrb[44].mxu1  ;;  %v1197_v17 = vpop.f32.mrb[46].mxu0 }
 0x159   : > { %v972_v8 = vadd.f32 %v971_v55, %v5266_v61  ;;  %v3893_v9 = vpop.f32.mrb[45].mxu1  ;;  %v5388_v0 = vadd.f32 %v1197_v17, %v967_v6  ;;  %v3946_v29 = vpop.f32.mrb[47].mxu0 }
 0x15a   : > { %v974_v41 = vpop.f32.mrb[46].mxu1  ;;  %v1928_v9 = vsel %vm1911_vm8, %v1925_v51, %v1927_v42 }
 0x15b   : > { %v975_v18 = vadd.f32 %v974_v41, %v5271_v16  ;;  %4172 = vmatmul.mubr.msk.bf16.gmra.mrb[152].mxu0 %vm415_vm1, %v2172_v34  ;;  %v3894_v56 = vpop.f32.mrb[47].mxu1  ;;  %v5413_v41 = vld [vmem:[#allocation2 + $0x48] sm:$0xff] }
 0x15c   : > { %4175 = vmatprep.mubr.msk.bf16.mxu0 %vm4591_vm0, %v6047_v53  ;;  %v2175_v46 = vrot.slane %v5413_v41, 2  ;;  %v1929_v51 = vrot.slane %v5413_v41, 6 }
 0x15d   : > { %4120 = vmatmul.mubr.msk.bf16.gmra.mrb[152].mxu1 %vm415_vm1, %v1926_v14 }
 0x15e   : > { %v1202_v61 = vpop.f32.mrb[48].mxu0  ;;  %4123 = vmatprep.mubr.msk.bf16.mxu1 %vm4591_vm0, %v6047_v53 }
 0x15f   : > { %v5402_v25 = vadd.f32 %v1202_v61, %v972_v8  ;;  %v3949_v16 = vpop.f32.mrb[49].mxu0  ;;  %v2176_v61 = vsel %vm2159_vm9, %v2173_v50, %v2175_v46 }
 0x160   : > { %v979_v39 = vpop.f32.mrb[48].mxu1  ;;  %v1205_v6 = vpop.f32.mrb[50].mxu0 }
 0x161   : > { %v980_v32 = vadd.f32 %v979_v39, %v5288_v19  ;;  %v3897_v57 = vpop.f32.mrb[49].mxu1  ;;  %v5406_v55 = vadd.f32 %v1205_v6, %v975_v18  ;;  %v3950_v17 = vpop.f32.mrb[51].mxu0 }
 0x162   : > { %v982_v34 = vpop.f32.mrb[50].mxu1  ;;  %v1930_v17 = vsel %vm1911_vm8, %v1927_v42, %v1929_v51 }
 0x163   : > { %v983_v29 = vadd.f32 %v982_v34, %v5297_v35  ;;  %4176 = vmatmul.mubr.msk.bf16.gmra.mrb[156].mxu0 %vm415_vm1, %v2174_v36  ;;  %v3898_v8 = vpop.f32.mrb[51].mxu1 }
 0x164   : > { %4179 = vmatprep.mubr.msk.bf16.mxu0 %vm4591_vm0, %v6047_v53 }
 0x165   : > { %4124 = vmatmul.mubr.msk.bf16.gmra.mrb[156].mxu1 %vm415_vm1, %v1928_v9  ;;  %v5431_v9 = vld [vmem:[#allocation2 + $0x50] sm:$0xff] }
 0x166   : > { %v1210_v19 = vpop.f32.mrb[52].mxu0  ;;  %4127 = vmatprep.mubr.msk.bf16.mxu1 %vm4591_vm0, %v6047_v53  ;;  %v2177_v50 = vrot.slane %v5431_v9, 2  ;;  %v1931_v42 = vrot.slane %v5431_v9, 6 }
 0x167   : > { %v5420_v14 = vadd.f32 %v1210_v19, %v980_v32  ;;  %v3953_v35 = vpop.f32.mrb[53].mxu0 }
 0x168   : > { %v987_v18 = vpop.f32.mrb[52].mxu1  ;;  %v1213_v56 = vpop.f32.mrb[54].mxu0  ;;  %v2178_v35 = vsel %vm2159_vm9, %v2175_v46, %v2177_v50 }
 0x169   : > { %v988_v16 = vadd.f32 %v987_v18, %v5167_v59  ;;  %v3901_v39 = vpop.f32.mrb[53].mxu1  ;;  %v5424_v6 = vadd.f32 %v1213_v56, %v983_v29  ;;  %v3954_v36 = vpop.f32.mrb[55].mxu0 }
 0x16a   : > { %v990_v57 = vpop.f32.mrb[54].mxu1 }
 0x16b   : > { %v991_v34 = vadd.f32 %v990_v57, %v5172_v7  ;;  %4180 = vmatmul.mubr.msk.bf16.gmra.mrb[160].mxu0 %vm415_vm1, %v2176_v61  ;;  %v3902_v32 = vpop.f32.mrb[55].mxu1  ;;  %v1932_v57 = vsel %vm1911_vm8, %v1929_v51, %v1931_v42 }
 0x16c   : > { %4183 = vmatprep.mubr.msk.bf16.mxu0 %vm4591_vm0, %v6047_v53  ;;  %v5449_v32 = vld [vmem:[#allocation2 + $0x58] sm:$0xff] }
 0x16d   : > { %4128 = vmatmul.mubr.msk.bf16.gmra.mrb[160].mxu1 %vm415_vm1, %v1930_v17  ;;  %6048 = vst [vmem:[#allocation10_spill] sm:$0xff] %v5449_v32  ;;  %v2179_v46 = vrot.slane %v5449_v32, 2  ;;  %v1933_v51 = vrot.slane %v5449_v32, 6 }
 0x16e   : > { %v1218_v59 = vpop.f32.mrb[56].mxu0  ;;  %4131 = vmatprep.mubr.msk.bf16.mxu1 %vm4591_vm0, %v6047_v53 }
 0x16f   : > { %v5438_v29 = vadd.f32 %v1218_v59, %v988_v16  ;;  %v3957_v7 = vpop.f32.mrb[57].mxu0 }
 0x170   : > { %v995_v8 = vpop.f32.mrb[56].mxu1  ;;  %v1221_v19 = vpop.f32.mrb[58].mxu0 }
 0x171   : > { %v996_v18 = vadd.f32 %v995_v8, %v5186_v22  ;;  %v3905_v56 = vpop.f32.mrb[57].mxu1  ;;  %v5442_v61 = vadd.f32 %v1221_v19, %v991_v34  ;;  %v3958_v39 = vpop.f32.mrb[59].mxu0  ;;  %v2180_v8 = vsel %vm2159_vm9, %v2177_v50, %v2179_v46  ;;  %v1935_v50 = vrot.slane %v5218_v4, 6 }
 0x172   : > { %v998_v36 = vpop.f32.mrb[58].mxu1 }
 0x173   : > { %v999_v17 = vadd.f32 %v998_v36, %v5191_v33  ;;  %4184 = vmatmul.mubr.msk.bf16.gmra.mrb[164].mxu0 %vm415_vm1, %v2178_v35  ;;  %v3906_v16 = vpop.f32.mrb[59].mxu1 }
 0x174   : > { %4187 = vmatprep.mubr.msk.bf16.mxu0 %vm4591_vm0, %v6047_v53 }
 0x175   : > { %4132 = vmatmul.mubr.msk.bf16.gmra.mrb[164].mxu1 %vm415_vm1, %v1932_v57  ;;  %v1934_v57 = vsel %vm1911_vm8, %v1931_v42, %v1933_v51 }
 0x176   : > { %v1226_v22 = vpop.f32.mrb[60].mxu0  ;;  %4135 = vmatprep.mubr.msk.bf16.mxu1 %vm4591_vm0, %v6047_v53 }
 0x177   : > { %v5456_v34 = vadd.f32 %v1226_v22, %v996_v18  ;;  %v3961_v33 = vpop.f32.mrb[61].mxu0  ;;  %v2181_v22 = vrot.slane %v5218_v4, 2 }
 0x178   : > { %v1003_v59 = vpop.f32.mrb[60].mxu1  ;;  %v1229_v7 = vpop.f32.mrb[62].mxu0 }
 0x179   : > { %v1004_v19 = vadd.f32 %v1003_v59, %v5207_v52  ;;  %v3909_v35 = vpop.f32.mrb[61].mxu1  ;;  %v5460_v56 = vadd.f32 %v1229_v7, %v999_v17  ;;  %v3962_v39 = vpop.f32.mrb[63].mxu0  ;;  %v2182_v59 = vsel %vm2159_vm9, %v2179_v46, %v2181_v22  ;;  %v1937_v46 = vrot.slane %v5239_v47, 6 }
 0x17a   : > { %v1006_v36 = vpop.f32.mrb[62].mxu1 }
 0x17b   : > { %v1007_v16 = vadd.f32 %v1006_v36, %v5212_v60  ;;  %4188 = vmatmul.mubr.msk.bf16.gmra.mrb[168].mxu0 %vm415_vm1, %v2180_v8  ;;  %v3910_v18 = vpop.f32.mrb[63].mxu1  ;;  %v2152_v36 = vld [vmem:[#allocation2 + $0x68] sm:$0x3f]  ;;  %v1938_v47 = vsel %vm1911_vm8, %v1935_v50, %v1937_v46 }
 0x17c   : > { %4191 = vmatprep.mubr.msk.bf16.mxu0 %vm4591_vm0, %v6047_v53  ;;  %v1936_v18 = vsel %vm1911_vm8, %v1933_v51, %v1935_v50  ;;  %v2407_v51 = vshll.u32 %v5276_v40, 16 }
 0x17d   : > { %4136 = vmatmul.mubr.msk.bf16.gmra.mrb[168].mxu1 %vm415_vm1, %v1934_v57 }
 0x17e   : > { %v1234_v52 = vpop.f32.mrb[64].mxu0  ;;  %4139 = vmatprep.mubr.msk.bf16.mxu1 %vm4591_vm0, %v6047_v53 }
 0x17f   : > { %v5472_v17 = vadd.f32 %v1234_v52, %v1004_v19  ;;  %v3965_v42 = vpop.f32.mrb[65].mxu0  ;;  %v2183_v52 = vrot.slane %v2152_v36, 2 }
 0x180   : > { %v1011_v60 = vpop.f32.mrb[64].mxu1  ;;  %v1237_v33 = vpop.f32.mrb[66].mxu0 }
 0x181   : > { %v1012_v7 = vadd.f32 %v1011_v60, %v5232_v13  ;;  %v3913_v8 = vpop.f32.mrb[65].mxu1  ;;  %v5476_v35 = vadd.f32 %v1237_v33, %v1007_v16  ;;  %v3966_v39 = vpop.f32.mrb[67].mxu0  ;;  %v2404_v16 = vshrl.u32 %v5276_v40, 16 }
 0x182   : > { %v1014_v57 = vpop.f32.mrb[66].mxu1 }
 0x183   : > { %6049 = vst [vmem:[#allocation11_spill] sm:$0xff] %v5476_v35  ;;  %v1015_v32 = vadd.f32 %v1014_v57, %v5241_v11  ;;  %4192 = vmatmul.mubr.msk.bf16.gmra.mrb[172].mxu0 %vm415_vm1, %v2182_v59  ;;  %v3914_v19 = vpop.f32.mrb[67].mxu1  ;;  %v2184_v59 = vsel %vm2159_vm9, %v2181_v22, %v2183_v52  ;;  %v2409_v35 = vrot.slane %v2407_v51, 3 }
 0x184   : > { %4195 = vmatprep.mubr.msk.bf16.mxu0 %vm4591_vm0, %v6047_v53  ;;  %v2406_v19 = vrot.slane %v2404_v16, 2 }
 0x185   : > { %4140 = vmatmul.mubr.msk.bf16.gmra.mrb[172].mxu1 %vm415_vm1, %v1936_v18 }
 0x186   : > { %v1242_v13 = vpop.f32.mrb[68].mxu0  ;;  %4143 = vmatprep.mubr.msk.bf16.mxu1 %vm4591_vm0, %v6047_v53 }
 0x187   : > { %v5489_v11 = vadd.f32 %v1242_v13, %v1012_v7  ;;  %v3969_v42 = vpop.f32.mrb[69].mxu0 }
 0x188   : > { %v1019_v60 = vpop.f32.mrb[68].mxu1  ;;  %v1245_v33 = vpop.f32.mrb[70].mxu0 }
 0x189   : > { %v1020_v8 = vadd.f32 %v1019_v60, %v5256_v30  ;;  %v3917_v39 = vpop.f32.mrb[69].mxu1  ;;  %v5493_v36 = vadd.f32 %v1245_v33, %v1015_v32  ;;  %v3970_v57 = vpop.f32.mrb[71].mxu0  ;;  %v2410_v32 = vor.u32 %v2409_v35, %v2406_v19  ;;  %v2676_v60 = vld [vmem:[#allocation2 + $0x8] sm:$0xf8]  ;;  %v2416_v35 = vrot.slane %v4777_v45, 3 }
 0x18a   : > { %v1022_v18 = vpop.f32.mrb[70].mxu1  ;;  %v2415_v39 = vrot.slane %v4828_v3, 2  ;;  %v4476_v57 = vld [vmem:[#allocation2 + $0x10] sm:$0xff] }
 0x18b   : > { %v1023_v40 = vadd.f32 %v1022_v18, %v5259_v54  ;;  %4196 = vmatmul.mubr.msk.bf16.gmra.mrb[176].mxu0 %vm415_vm1, %v2184_v59  ;;  %v3918_v7 = vpop.f32.mrb[71].mxu1  ;;  %v2414_v59 = vsel %vm2402_vm10, %v2410_v32, %v5215_v2  ;;  %v2685_v18 = vrot.slane %v4476_v57, 3 }
 0x18c   : > { %4199 = vmatprep.mubr.msk.bf16.mxu0 %vm4591_vm0, %v6047_v53  ;;  %v2417_v19 = vor.u32 %v2416_v35, %v2415_v39 }
 0x18d   : > { %4144 = vmatmul.mubr.msk.bf16.gmra.mrb[176].mxu1 %vm415_vm1, %v1938_v47 }
 0x18e   : > { %v1250_v30 = vpop.f32.mrb[72].mxu0  ;;  %4207 = vmatprep.mubr.msk.bf16.mxu1 %vm4591_vm0, %v6047_v53 }
 0x18f   : > { %v5503_v22 = vadd.f32 %v1250_v30, %v1020_v8  ;;  %v3973_v50 = vpop.f32.mrb[73].mxu0 }
 0x190   : > { %v1027_v13 = vpop.f32.mrb[72].mxu1  ;;  %v1253_v46 = vpop.f32.mrb[74].mxu0 }
 0x191   : > { %v1028_v54 = vadd.f32 %v1027_v13, %v5273_v28  ;;  %v5506_v16 = vadd.f32 %v1253_v46, %v1023_v40  ;;  %v3974_v51 = vpop.f32.mrb[75].mxu0  ;;  %v3921_v42 = vpop.f32.mrb[73].mxu1  ;;  %v2684_v28 = vrot.slane %v2676_v60, 3  ;;  %v2418_v46 = vsel %vm2402_vm10, %v5215_v2, %v2417_v19 }
 0x192   : > { %v1030_v33 = vpop.f32.mrb[74].mxu1  ;;  %v2419_v51 = vrot.slane %v4850_v12, 2  ;;  %v2420_v42 = vrot.slane %v4819_v62, 3 }
 0x193   : > { %4200 = vmatmul.mubr.msk.bf16.gmra.mrb[180].mxu0 %vm415_vm1, %v2183_v52  ;;  %v3922_v8 = vpop.f32.mrb[75].mxu1  ;;  %v2686_v7 = vsel %vm2683_vm11, %v2684_v28, %v2685_v18  ;;  %v4477_v33 = vld [vmem:[#allocation2 + $0x18] sm:$0xff] }
 0x194   : > { %4263 = vmatprep.mubr.msk.bf16.mxu0 %vm4591_vm0, %v6047_v53  ;;  %v2421_v2 = vor.u32 %v2420_v42, %v2419_v51 }
 0x195   : > { %4208 = vmatmul.mubr.msk.bf16.vlgmr.msra.gmra.mrb[180].mxu1 %vm415_vm1, %v2414_v59 }
 0x196   : > { %v1258_v47 = vpop.f32.mrb[76].mxu0  ;;  %4211 = vmatprep.mubr.msk.bf16.mxu1 %vm4591_vm0, %v6047_v53 }
 0x197   : > { %v5518_v3 = vadd.f32 %v1258_v47, %v1028_v54  ;;  %v3977_v45 = vpop.f32.mrb[77].mxu0 }
 0x198   : > { %v1434_v40 = vpop.f32.mrb[76].mxu1  ;;  %v1261_v52 = vpop.f32.mrb[78].mxu0 }
 0x199   : > { %v1536_v30 = vadd.f32 %v1434_v40, %v5318_v63  ;;  %v3985_v32 = vpop.f32.mrb[77].mxu1  ;;  %v3978_v50 = vpop.f32.mrb[79].mxu0  ;;  %v2687_v63 = vrot.slane %v4477_v33, 3  ;;  %v2422_v40 = vsel %vm2402_vm10, %v2417_v19, %v2421_v2  ;;  %v2423_v52 = vrot.slane %v4883_v43, 2 }
 0x19a   : > { %v1437_v13 = vpop.f32.mrb[78].mxu1 }
 0x19b   : > { %v1537_v54 = vadd.f32 %v1437_v13, %v5322_v27  ;;  %4264 = vmatmul.mubr.msk.bf16.vlgmr.msra.gmra.mrb[184].mxu0 %vm415_vm1, %v2686_v7  ;;  %v3986_v60 = vpop.f32.mrb[79].mxu1  ;;  %v2688_v35 = vsel %vm2683_vm11, %v2685_v18, %v2687_v63  ;;  %v2424_v7 = vrot.slane %v4855_v20, 3 }
 0x19c   : > { %4267 = vmatprep.mubr.msk.bf16.mxu0 %vm4591_vm0, %v6047_v53 }
 0x19d   : > { %4212 = vmatmul.mubr.msk.bf16.gmra.mrb[184].mxu1 %vm415_vm1, %v2418_v46  ;;  %v2425_v19 = vor.u32 %v2424_v7, %v2423_v52 }
 0x19e   : > { %v1777_v59 = vpop.f32.mrb[80].mxu0  ;;  %4215 = vmatprep.mubr.msk.bf16.mxu1 %vm4591_vm0, %v6047_v53 }
 0x19f   : > { %v5533_v12 = vadd.f32 %v1777_v59, %v1536_v30  ;;  %v4041_v62 = vpop.f32.mrb[81].mxu0  ;;  %v2426_v59 = vsel %vm2402_vm10, %v2421_v2, %v2425_v19 }
 0x1a0   : > { %v1442_v39 = vpop.f32.mrb[80].mxu1  ;;  %v1780_v27 = vpop.f32.mrb[82].mxu0  ;;  %v2427_v62 = vrot.slane %v4906_v58, 2 }
 0x1a1   : > { %v1538_v8 = vadd.f32 %v1442_v39, %v5334_v15  ;;  %v3989_v28 = vpop.f32.mrb[81].mxu1  ;;  %v5537_v57 = vadd.f32 %v1780_v27, %v1537_v54  ;;  %v4042_v47 = vpop.f32.mrb[83].mxu0  ;;  %v4478_v15 = vld [vmem:[#allocation2 + $0x20] sm:$0xff]  ;;  %v2428_v39 = vrot.slane %v4886_v44, 3 }
 0x1a2   : > { %v1445_v45 = vpop.f32.mrb[82].mxu1  ;;  %v2689_v18 = vrot.slane %v4478_v15, 3  ;;  %v2431_v15 = vrot.slane %v4730_v24, 2 }
 0x1a3   : > { %v1539_v30 = vadd.f32 %v1445_v45, %v5338_v31  ;;  %4268 = vmatmul.mubr.msk.bf16.gmra.mrb[188].mxu0 %vm415_vm1, %v2688_v35  ;;  %v3990_v32 = vpop.f32.mrb[83].mxu1  ;;  %v2429_v2 = vor.u32 %v2428_v39, %v2427_v62 }
 0x1a4   : > { %4271 = vmatprep.mubr.msk.bf16.mxu0 %vm4591_vm0, %v6047_v53  ;;  %v2690_v46 = vsel %vm2683_vm11, %v2687_v63, %v2689_v18 }
 0x1a5   : > { %4216 = vmatmul.mubr.msk.bf16.gmra.mrb[188].mxu1 %vm415_vm1, %v2422_v40  ;;  %v2430_v32 = vsel %vm2402_vm10, %v2425_v19, %v2429_v2 }
 0x1a6   : > { %v1785_v50 = vpop.f32.mrb[84].mxu0  ;;  %4219 = vmatprep.mubr.msk.bf16.mxu1 %vm4591_vm0, %v6047_v53 }
 0x1a7   : > { %v5549_v43 = vadd.f32 %v1785_v50, %v1538_v8  ;;  %v4045_v20 = vpop.f32.mrb[85].mxu0  ;;  %v2432_v50 = vrot.slane %v4727_v23, 3 }
 0x1a8   : > { %v1450_v13 = vpop.f32.mrb[84].mxu1  ;;  %v1788_v31 = vpop.f32.mrb[86].mxu0 }
 0x1a9   : > { %v1540_v51 = vadd.f32 %v1450_v13, %v5350_v48  ;;  %v3993_v42 = vpop.f32.mrb[85].mxu1  ;;  %v5553_v54 = vadd.f32 %v1788_v31, %v1539_v30  ;;  %v4046_v60 = vpop.f32.mrb[87].mxu0  ;;  %v4479_v48 = vld [vmem:[#allocation2 + $0x28] sm:$0xff]  ;;  %v2433_v19 = vor.u32 %v2432_v50, %v2431_v15  ;;  %v6051_v15 = vld [vmem:[#allocation4_spill] sm:$0xff] }
 0x1aa   : > { %v1453_v33 = vpop.f32.mrb[86].mxu1  ;;  %v2691_v63 = vrot.slane %v4479_v48, 3  ;;  %v2440_v50 = vrot.slane %v6051_v15, 3 }
 0x1ab   : > { %v1541_v27 = vadd.f32 %v1453_v33, %v5354_v5  ;;  %4272 = vmatmul.mubr.msk.bf16.gmra.mrb[192].mxu0 %vm415_vm1, %v2690_v46  ;;  %v3994_v35 = vpop.f32.mrb[87].mxu1  ;;  %v2434_v39 = vsel %vm2402_vm10, %v2429_v2, %v2433_v19 }
 0x1ac   : > { %4275 = vmatprep.mubr.msk.bf16.mxu0 %vm4591_vm0, %v6047_v53  ;;  %v2692_v47 = vsel %vm2683_vm11, %v2689_v18, %v2691_v63  ;;  %v2436_v35 = vrot.slane %v4735_v26, 3 }
 0x1ad   : > { %4220 = vmatmul.mubr.msk.bf16.gmra.mrb[192].mxu1 %vm415_vm1, %v2426_v59 }
 0x1ae   : > { %v1793_v8 = vpop.f32.mrb[88].mxu0  ;;  %4223 = vmatprep.mubr.msk.bf16.mxu1 %vm4591_vm0, %v6047_v53 }
 0x1af   : > { %v5565_v58 = vadd.f32 %v1793_v8, %v1540_v51  ;;  %v4049_v44 = vpop.f32.mrb[89].mxu0 }
 0x1b0   : > { %v1458_v28 = vpop.f32.mrb[88].mxu1  ;;  %v1796_v5 = vpop.f32.mrb[90].mxu0 }
 0x1b1   : > { %v1542_v45 = vadd.f32 %v1458_v28, %v5366_v38  ;;  %v3997_v40 = vpop.f32.mrb[89].mxu1  ;;  %v5569_v52 = vadd.f32 %v1796_v5, %v1541_v27  ;;  %v4050_v7 = vpop.f32.mrb[91].mxu0  ;;  %v4480_v38 = vld [vmem:[#allocation2 + $0x30] sm:$0xff]  ;;  %v2435_v27 = vrot.slane %v4757_v37, 2 }
 0x1b2   : > { %v1461_v30 = vpop.f32.mrb[90].mxu1  ;;  %v2693_v18 = vrot.slane %v4480_v38, 3 }
 0x1b3   : > { %v1543_v20 = vadd.f32 %v1461_v30, %v5370_v1  ;;  %4276 = vmatmul.mubr.msk.bf16.gmra.mrb[196].mxu0 %vm415_vm1, %v2692_v47  ;;  %v3998_v13 = vpop.f32.mrb[91].mxu1  ;;  %v2437_v2 = vor.u32 %v2436_v35, %v2435_v27  ;;  %v6050_v30 = vld [vmem:[#allocation5_spill] sm:$0xff]  ;;  %v6053_v27 = vld [vmem:[#allocation6_spill] sm:$0xff] }
 0x1b4   : > { %4279 = vmatprep.mubr.msk.bf16.mxu0 %vm4591_vm0, %v6047_v53  ;;  %v2694_v51 = vsel %vm2683_vm11, %v2691_v63, %v2693_v18  ;;  %v2444_v35 = vrot.slane %v6053_v27, 3 }
 0x1b5   : > { %4224 = vmatmul.mubr.msk.bf16.gmra.mrb[196].mxu1 %vm415_vm1, %v2430_v32  ;;  %v2438_v7 = vsel %vm2402_vm10, %v2433_v19, %v2437_v2  ;;  %v2439_v32 = vrot.slane %v6050_v30, 2 }
 0x1b6   : > { %v1801_v31 = vpop.f32.mrb[92].mxu0  ;;  %4227 = vmatprep.mubr.msk.bf16.mxu1 %vm4591_vm0, %v6047_v53 }
 0x1b7   : > { %v5581_v24 = vadd.f32 %v1801_v31, %v1542_v45  ;;  %v4053_v23 = vpop.f32.mrb[93].mxu0 }
 0x1b8   : > { %v1466_v46 = vpop.f32.mrb[92].mxu1  ;;  %v1804_v1 = vpop.f32.mrb[94].mxu0 }
 0x1b9   : > { %v1544_v42 = vadd.f32 %v1466_v46, %v5384_v21  ;;  %v4001_v60 = vpop.f32.mrb[93].mxu1  ;;  %v5585_v33 = vadd.f32 %v1804_v1, %v1543_v20  ;;  %v4054_v59 = vpop.f32.mrb[95].mxu0  ;;  %v2695_v21 = vrot.slane %v5377_v10, 3 }
 0x1ba   : > { %v1469_v62 = vpop.f32.mrb[94].mxu1 }
 0x1bb   : > { %v1545_v48 = vadd.f32 %v1469_v62, %v5388_v0  ;;  %4280 = vmatmul.mubr.msk.bf16.gmra.mrb[200].mxu0 %vm415_vm1, %v2694_v51  ;;  %v4002_v8 = vpop.f32.mrb[95].mxu1  ;;  %v2696_v28 = vsel %vm2683_vm11, %v2693_v18, %v2695_v21  ;;  %v2441_v18 = vor.u32 %v2440_v50, %v2439_v32  ;;  %v6052_v62 = vld [vmem:[#allocation8_spill] sm:$0xff]  ;;  %v6055_v32 = vld [vmem:[#allocation7_spill] sm:$0xff] }
 0x1bc   : > { %4283 = vmatprep.mubr.msk.bf16.mxu0 %vm4591_vm0, %v6047_v53  ;;  %v2448_v15 = vrot.slane %v6055_v32, 3 }
 0x1bd   : > { %4228 = vmatmul.mubr.msk.bf16.gmra.mrb[200].mxu1 %vm415_vm1, %v2434_v39  ;;  %v2442_v59 = vsel %vm2402_vm10, %v2437_v2, %v2441_v18  ;;  %v2443_v39 = vrot.slane %v6052_v62, 2  ;;  %v6057_v62 = vshll.u32 %v5218_v4, 16 }
 0x1be   : > { %v1809_v63 = vpop.f32.mrb[96].mxu0  ;;  %4231 = vmatprep.mubr.msk.bf16.mxu1 %vm4591_vm0, %v6047_v53 }
 0x1bf   : > { %v5598_v37 = vadd.f32 %v1809_v63, %v1544_v42  ;;  %v4057_v26 = vpop.f32.mrb[97].mxu0  ;;  %v2445_v63 = vor.u32 %v2444_v35, %v2443_v39  ;;  %v2452_v39 = vrot.slane %v6057_v62, 3 }
 0x1c0   : > { %v1474_v44 = vpop.f32.mrb[96].mxu1  ;;  %v1812_v0 = vpop.f32.mrb[98].mxu0 }
 0x1c1   : > { %v1546_v5 = vadd.f32 %v1474_v44, %v5402_v25  ;;  %v4005_v47 = vpop.f32.mrb[97].mxu1  ;;  %v5602_v45 = vadd.f32 %v1812_v0, %v1545_v48  ;;  %v4058_v10 = vpop.f32.mrb[99].mxu0  ;;  %v2697_v25 = vrot.slane %v5395_v49, 3 }
 0x1c2   : > { %v1477_v40 = vpop.f32.mrb[98].mxu1 }
 0x1c3   : > { %v1547_v20 = vadd.f32 %v1477_v40, %v5406_v55  ;;  %4284 = vmatmul.mubr.msk.bf16.gmra.mrb[204].mxu0 %vm415_vm1, %v2696_v28  ;;  %v4006_v13 = vpop.f32.mrb[99].mxu1  ;;  %v2698_v46 = vsel %vm2683_vm11, %v2695_v21, %v2697_v25  ;;  %v2446_v40 = vsel %vm2402_vm10, %v2441_v18, %v2445_v63 }
 0x1c4   : > { %4287 = vmatprep.mubr.msk.bf16.mxu0 %vm4591_vm0, %v6047_v53 }
 0x1c5   : > { %4232 = vmatmul.mubr.msk.bf16.gmra.mrb[204].mxu1 %vm415_vm1, %v2438_v7  ;;  %v6054_v7 = vld [vmem:[#allocation9_spill] sm:$0xff] }
 0x1c6   : > { %v1817_v38 = vpop.f32.mrb[100].mxu0  ;;  %4235 = vmatprep.mubr.msk.bf16.mxu1 %vm4591_vm0, %v6047_v53  ;;  %v2447_v30 = vrot.slane %v6054_v7, 2 }
 0x1c7   : > { %v5615_v31 = vadd.f32 %v1817_v38, %v1546_v5  ;;  %v4061_v19 = vpop.f32.mrb[101].mxu0 }
 0x1c8   : > { %v1482_v23 = vpop.f32.mrb[100].mxu1  ;;  %v1820_v55 = vpop.f32.mrb[102].mxu0 }
 0x1c9   : > { %v1548_v1 = vadd.f32 %v1482_v23, %v5420_v14  ;;  %v4009_v51 = vpop.f32.mrb[101].mxu1  ;;  %v5619_v42 = vadd.f32 %v1820_v55, %v1547_v20  ;;  %v4062_v49 = vpop.f32.mrb[103].mxu0  ;;  %v2699_v14 = vrot.slane %v5413_v41, 3 }
 0x1ca   : > { %v1485_v60 = vpop.f32.mrb[102].mxu1 }
 0x1cb   : > { %v1549_v48 = vadd.f32 %v1485_v60, %v5424_v6  ;;  %4288 = vmatmul.mubr.msk.bf16.gmra.mrb[208].mxu0 %vm415_vm1, %v2698_v46  ;;  %v4010_v8 = vpop.f32.mrb[103].mxu1  ;;  %v2700_v0 = vsel %vm2683_vm11, %v2697_v25, %v2699_v14  ;;  %v2449_v25 = vor.u32 %v2448_v15, %v2447_v30  ;;  %v6056_v60 = vshrl.u32 %v5218_v4, 16  ;;  %v6059_v15 = vld [vmem:[#allocation11_spill] sm:$0xff] }
 0x1cc   : > { %4291 = vmatprep.mubr.msk.bf16.mxu0 %vm4591_vm0, %v6047_v53 }
 0x1cd   : > { %4236 = vmatmul.mubr.msk.bf16.gmra.mrb[208].mxu1 %vm415_vm1, %v2442_v59  ;;  %v2450_v49 = vsel %vm2402_vm10, %v2445_v63, %v2449_v25  ;;  %v2451_v59 = vrot.slane %v6056_v60, 2 }
 0x1ce   : > { %v1825_v21 = vpop.f32.mrb[104].mxu0  ;;  %4239 = vmatprep.mubr.msk.bf16.mxu1 %vm4591_vm0, %v6047_v53 }
 0x1cf   : > { %v5632_v2 = vadd.f32 %v1825_v21, %v1548_v1  ;;  %v4065_v26 = vpop.f32.mrb[105].mxu0  ;;  %v2453_v4 = vor.u32 %v2452_v39, %v2451_v59 }
 0x1d0   : > { %v1490_v44 = vpop.f32.mrb[104].mxu1  ;;  %v1828_v6 = vpop.f32.mrb[106].mxu0 }
 0x1d1   : > { %v1550_v28 = vadd.f32 %v1490_v44, %v5438_v29  ;;  %v4013_v5 = vpop.f32.mrb[105].mxu1  ;;  %v5636_v47 = vadd.f32 %v1828_v6, %v1549_v48  ;;  %v4066_v41 = vpop.f32.mrb[107].mxu0  ;;  %v2701_v29 = vrot.slane %v5431_v9, 3  ;;  %v5662_v48 = vld [vmem:[#allocation2 + $0x68] sm:$0x7f]  ;;  %v2454_v7 = vsel %vm2402_vm10, %v2449_v25, %v2453_v4 }
 0x1d2   : > { %v1493_v10 = vpop.f32.mrb[106].mxu1  ;;  %v2456_v21 = vshrl.u32 %v5662_v48, 16 }
 0x1d3   : > { %v1551_v50 = vadd.f32 %v1493_v10, %v5442_v61  ;;  %4292 = vmatmul.mubr.msk.bf16.gmra.mrb[212].mxu0 %vm415_vm1, %v2700_v0  ;;  %v4014_v20 = vpop.f32.mrb[107].mxu1  ;;  %v2702_v23 = vsel %vm2683_vm11, %v2699_v14, %v2701_v29 }
 0x1d4   : > { %4295 = vmatprep.mubr.msk.bf16.mxu0 %vm4591_vm0, %v6047_v53  ;;  %v2458_v30 = vrot.slane %v2456_v21, 2 }
 0x1d5   : > { %4240 = vmatmul.mubr.msk.bf16.gmra.mrb[212].mxu1 %vm415_vm1, %v2446_v40 }
 0x1d6   : > { %v1833_v13 = vpop.f32.mrb[108].mxu0  ;;  %4243 = vmatprep.mubr.msk.bf16.mxu1 %vm4591_vm0, %v6047_v53 }
 0x1d7   : > { %v5649_v38 = vadd.f32 %v1833_v13, %v1550_v28  ;;  %v4069_v18 = vpop.f32.mrb[109].mxu0 }
 0x1d8   : > { %v1498_v19 = vpop.f32.mrb[108].mxu1  ;;  %v1836_v61 = vpop.f32.mrb[110].mxu0 }
 0x1d9   : > { %v1552_v55 = vadd.f32 %v1498_v19, %v5456_v34  ;;  %v4017_v46 = vpop.f32.mrb[109].mxu1  ;;  %v5653_v1 = vadd.f32 %v1836_v61, %v1551_v50  ;;  %v4070_v9 = vpop.f32.mrb[111].mxu0  ;;  %v6058_v34 = vld [vmem:[#allocation10_spill] sm:$0xff] }
 0x1da   : > { %v1501_v51 = vpop.f32.mrb[110].mxu1  ;;  %v2703_v8 = vrot.slane %v6058_v34, 3 }
 0x1db   : > { %v1553_v27 = vadd.f32 %v1501_v51, %v5460_v56  ;;  %4296 = vmatmul.mubr.msk.bf16.gmra.mrb[216].mxu0 %vm415_vm1, %v2702_v23  ;;  %v4018_v35 = vpop.f32.mrb[111].mxu1  ;;  %v2459_v56 = vshll.u32 %v5662_v48, 16 }
 0x1dc   : > { %4299 = vmatprep.mubr.msk.bf16.mxu0 %vm4591_vm0, %v6047_v53  ;;  %v2704_v0 = vsel %vm2683_vm11, %v2701_v29, %v2703_v8  ;;  %v4481_v29 = vld [vmem:[#allocation2 + $0x60] sm:$0xff] }
 0x1dd   : > { %4244 = vmatmul.mubr.msk.bf16.gmra.mrb[216].mxu1 %vm415_vm1, %v2450_v49  ;;  %v2461_v32 = vrot.slane %v2459_v56, 3  ;;  %v2705_v13 = vrot.slane %v4481_v29, 3 }
 0x1de   : > { %v1841_v14 = vpop.f32.mrb[112].mxu0  ;;  %4247 = vmatprep.mubr.msk.bf16.mxu1 %vm4591_vm0, %v6047_v53 }
 0x1df   : > { %v5672_v63 = vadd.f32 %v1841_v14, %v1552_v55  ;;  %v4073_v26 = vpop.f32.mrb[113].mxu0  ;;  %v2462_v18 = vor.u32 %v2461_v32, %v2458_v30  ;;  %v2706_v55 = vsel %vm2683_vm11, %v2703_v8, %v2705_v13 }
 0x1e0   : > { %v1506_v44 = vpop.f32.mrb[112].mxu1  ;;  %v1844_v6 = vpop.f32.mrb[114].mxu0 }
 0x1e1   : > { %v1554_v28 = vadd.f32 %v1506_v44, %v5472_v17  ;;  %v4021_v5 = vpop.f32.mrb[113].mxu1  ;;  %v5676_v41 = vadd.f32 %v1844_v6, %v1553_v27  ;;  %v4074_v10 = vpop.f32.mrb[115].mxu0  ;;  %v2463_v59 = vsel %vm2402_vm10, %v2453_v4, %v2462_v18  ;;  %v2707_v27 = vrot.slane %v5662_v48, 3 }
 0x1e2   : > { %v1509_v40 = vpop.f32.mrb[114].mxu1 }
 0x1e3   : > { %v1555_v50 = vadd.f32 %v1509_v40, %v6059_v15  ;;  %4300 = vmatmul.mubr.msk.bf16.gmra.mrb[220].mxu0 %vm415_vm1, %v2704_v0  ;;  %v4022_v20 = vpop.f32.mrb[115].mxu1 }
 0x1e4   : > { %4303 = vmatprep.mubr.msk.bf16.mxu0 %vm4591_vm0, %v6047_v53 }
 0x1e5   : > { %4248 = vmatmul.mubr.msk.bf16.gmra.mrb[220].mxu1 %vm415_vm1, %v2454_v7 }
 0x1e6   : > { %v1849_v17 = vpop.f32.mrb[116].mxu0  ;;  %4251 = vmatprep.mubr.msk.bf16.mxu1 %vm4591_vm0, %v6047_v53 }
 0x1e7   : > { %v5686_v25 = vadd.f32 %v1849_v17, %v1554_v28  ;;  %v4077_v19 = vpop.f32.mrb[117].mxu0 }
 0x1e8   : > { %v1514_v61 = vpop.f32.mrb[116].mxu1  ;;  %v1852_v23 = vpop.f32.mrb[118].mxu0 }
 0x1e9   : > { %v1556_v46 = vadd.f32 %v1514_v61, %v5489_v11  ;;  %v4025_v9 = vpop.f32.mrb[117].mxu1  ;;  %v5690_v51 = vadd.f32 %v1852_v23, %v1555_v50  ;;  %v4078_v49 = vpop.f32.mrb[119].mxu0 }
 0x1ea   : > { %v1517_v60 = vpop.f32.mrb[118].mxu1 }
 0x1eb   : > { %v1557_v62 = vadd.f32 %v1517_v60, %v5493_v36  ;;  %4304 = vmatmul.mubr.msk.bf16.gmra.mrb[224].mxu0 %vm415_vm1, %v2706_v55  ;;  %v4026_v39 = vpop.f32.mrb[119].mxu1  ;;  %v2708_v36 = vsel %vm2683_vm11, %v2705_v13, %v2707_v27 }
 0x1ec   : > { %4307 = vmatprep.mubr.msk.bf16.mxu0 %vm4591_vm0, %v6047_v53 }
 0x1ed   : > { %4252 = vmatmul.mubr.msk.bf16.gmra.mrb[224].mxu1 %vm415_vm1, %v2463_v59 }
 0x1ee   : > { %v1857_v11 = vpop.f32.mrb[120].mxu0  ;;  %4255 = vmatprep.mubr.msk.bf16.mxu1 %vm4591_vm0, %v6047_v53 }
 0x1ef   : > { %v5701_v35 = vadd.f32 %v1857_v11, %v1556_v46  ;;  %v4081_v34 = vpop.f32.mrb[121].mxu0 }
 0x1f0   : > { %v1522_v8 = vpop.f32.mrb[120].mxu1  ;;  %v1860_v14 = vpop.f32.mrb[122].mxu0 }
 0x1f1   : > { %v1558_v4 = vadd.f32 %v1522_v8, %v5503_v22  ;;  %v4029_v21 = vpop.f32.mrb[121].mxu1  ;;  %v5705_v56 = vadd.f32 %v1860_v14, %v1557_v62  ;;  %v4082_v26 = vpop.f32.mrb[123].mxu0 }
 0x1f2   : > { %v1525_v48 = vpop.f32.mrb[122].mxu1 }
 0x1f3   : > { %v1559_v44 = vadd.f32 %v1525_v48, %v5506_v16  ;;  %4308 = vmatmul.mubr.msk.bf16.gmra.mrb[228].mxu0 %vm415_vm1, %v2708_v36  ;;  %v4030_v6 = vpop.f32.mrb[123].mxu1 }
 0x1f4   : > { %4311 = vmatprep.mubr.msk.bf16.mxu0 %vm4591_vm0, %v6047_v53 }
 0x1f5   : > { %4256 = vmatmul.mubr.msk.bf16.gmra.mrb[228].mxu1 %vm415_vm1, %v2462_v18 }
 0x1f6   : > { %v1865_v0 = vpop.f32.mrb[124].mxu0 }
 0x1f7   : > { %v5712_v28 = vadd.f32 %v1865_v0, %v1558_v4  ;;  %v4085_v5 = vpop.f32.mrb[125].mxu0 }
 0x1f8   : > { %v1530_v22 = vpop.f32.mrb[124].mxu1  ;;  %v1868_v10 = vpop.f32.mrb[126].mxu0 }
 0x1f9   : > { %v1560_v40 = vadd.f32 %v1530_v22, %v5518_v3  ;;  %v5715_v7 = vadd.f32 %v1868_v10, %v1559_v44  ;;  %v4086_v30 = vpop.f32.mrb[127].mxu0  ;;  %v4033_v16 = vpop.f32.mrb[125].mxu1 }
 0x1fa   : > { %v1533_v32 = vpop.f32.mrb[126].mxu1 }
 0x1fb   : > { %4312 = vmatmul.mubr.msk.bf16.gmra.mrb[232].mxu0 %vm415_vm1, %v2707_v27  ;;  %v4034_v15 = vpop.f32.mrb[127].mxu1 }
 0x1fe   : > { %v1873_v50 = vpop.f32.mrb[128].mxu0 }
 0x1ff   : > { %v5718_v53 = vadd.f32 %v1873_v50, %v1560_v40  ;;  %v4089_v20 = vpop.f32.mrb[129].mxu0 }
 0x200   : > { %v2024_v29 = vpop.f32.mrb[128].mxu1  ;;  %v1876_v13 = vpop.f32.mrb[130].mxu0 }
 0x201   : > { %v2126_v17 = vadd.f32 %v2024_v29, %v5533_v12  ;;  %v4097_v18 = vpop.f32.mrb[129].mxu1  ;;  %v4090_v19 = vpop.f32.mrb[131].mxu0 }
 0x202   : > { %v2027_v61 = vpop.f32.mrb[130].mxu1 }
 0x203   : > { %v2127_v3 = vadd.f32 %v2027_v61, %v5537_v57  ;;  %v4098_v23 = vpop.f32.mrb[131].mxu1 }
 0x206   : > { %v2270_v55 = vpop.f32.mrb[132].mxu0 }
 0x207   : > { %v5722_v46 = vadd.f32 %v2270_v55, %v2126_v17  ;;  %v4153_v9 = vpop.f32.mrb[133].mxu0 }
 0x208   : > { %v2032_v49 = vpop.f32.mrb[132].mxu1  ;;  %v2273_v60 = vpop.f32.mrb[134].mxu0 }
 0x209   : > { %v2128_v59 = vadd.f32 %v2032_v49, %v5549_v43  ;;  %v4101_v62 = vpop.f32.mrb[133].mxu1  ;;  %v5725_v39 = vadd.f32 %v2273_v60, %v2127_v3  ;;  %v4154_v27 = vpop.f32.mrb[135].mxu0 }
 0x20a   : > { %v2035_v11 = vpop.f32.mrb[134].mxu1 }
 0x20b   : > { %v2129_v12 = vadd.f32 %v2035_v11, %v5553_v54  ;;  %v4102_v34 = vpop.f32.mrb[135].mxu1 }
 0x20e   : > { %v2278_v8 = vpop.f32.mrb[136].mxu0 }
 0x20f   : > { %v5728_v14 = vadd.f32 %v2278_v8, %v2128_v59  ;;  %v4157_v57 = vpop.f32.mrb[137].mxu0 }
 0x210   : > { %v2040_v36 = vpop.f32.mrb[136].mxu1  ;;  %v2281_v4 = vpop.f32.mrb[138].mxu0 }
 0x211   : > { %v2130_v21 = vadd.f32 %v2040_v36, %v5565_v58  ;;  %v4105_v26 = vpop.f32.mrb[137].mxu1  ;;  %v5731_v48 = vadd.f32 %v2281_v4, %v2129_v12  ;;  %v4158_v43 = vpop.f32.mrb[139].mxu0 }
 0x212   : > { %v2043_v44 = vpop.f32.mrb[138].mxu1 }
 0x213   : > { %v2131_v6 = vadd.f32 %v2043_v44, %v5569_v52  ;;  %v4106_v0 = vpop.f32.mrb[139].mxu1 }
 0x216   : > { %v2286_v5 = vpop.f32.mrb[140].mxu0 }
 0x217   : > { %v5734_v22 = vadd.f32 %v2286_v5, %v2130_v21  ;;  %v4161_v54 = vpop.f32.mrb[141].mxu0 }
 0x218   : > { %v2048_v10 = vpop.f32.mrb[140].mxu1  ;;  %v2289_v40 = vpop.f32.mrb[142].mxu0 }
 0x219   : > { %v2132_v30 = vadd.f32 %v2048_v10, %v5581_v24  ;;  %v4109_v16 = vpop.f32.mrb[141].mxu1  ;;  %v5737_v32 = vadd.f32 %v2289_v40, %v2131_v6  ;;  %v4162_v58 = vpop.f32.mrb[143].mxu0 }
 0x21a   : > { %v2051_v15 = vpop.f32.mrb[142].mxu1 }
 0x21b   : > { %v2133_v50 = vadd.f32 %v2051_v15, %v5585_v33  ;;  %v4110_v20 = vpop.f32.mrb[143].mxu1 }
 0x21e   : > { %v2294_v29 = vpop.f32.mrb[144].mxu0 }
 0x21f   : > { %v5740_v13 = vadd.f32 %v2294_v29, %v2132_v30  ;;  %v4165_v52 = vpop.f32.mrb[145].mxu0 }
 0x220   : > { %v2056_v17 = vpop.f32.mrb[144].mxu1  ;;  %v2297_v18 = vpop.f32.mrb[146].mxu0 }
 0x221   : > { %v2134_v19 = vadd.f32 %v2056_v17, %v5598_v37  ;;  %v4113_v61 = vpop.f32.mrb[145].mxu1  ;;  %v5743_v3 = vadd.f32 %v2297_v18, %v2133_v50  ;;  %v4166_v24 = vpop.f32.mrb[147].mxu0 }
 0x222   : > { %v2059_v23 = vpop.f32.mrb[146].mxu1 }
 0x223   : > { %v2135_v55 = vadd.f32 %v2059_v23, %v5602_v45  ;;  %v4114_v9 = vpop.f32.mrb[147].mxu1 }
 0x226   : > { %v2302_v49 = vpop.f32.mrb[148].mxu0 }
 0x227   : > { %v5746_v60 = vadd.f32 %v2302_v49, %v2134_v19  ;;  %v4169_v33 = vpop.f32.mrb[149].mxu0 }
 0x228   : > { %v2064_v59 = vpop.f32.mrb[148].mxu1  ;;  %v2305_v62 = vpop.f32.mrb[150].mxu0 }
 0x229   : > { %v2136_v27 = vadd.f32 %v2064_v59, %v5615_v31  ;;  %v4117_v11 = vpop.f32.mrb[149].mxu1  ;;  %v5749_v12 = vadd.f32 %v2305_v62, %v2135_v55  ;;  %v4170_v37 = vpop.f32.mrb[151].mxu0 }
 0x22a   : > { %v2067_v34 = vpop.f32.mrb[150].mxu1 }
 0x22b   : > { %v2137_v8 = vadd.f32 %v2067_v34, %v5619_v42  ;;  %v4118_v57 = vpop.f32.mrb[151].mxu1 }
 0x22e   : > { %v2310_v36 = vpop.f32.mrb[152].mxu0 }
 0x22f   : > { %v5752_v4 = vadd.f32 %v2310_v36, %v2136_v27  ;;  %v4173_v45 = vpop.f32.mrb[153].mxu0 }
 0x230   : > { %v2072_v21 = vpop.f32.mrb[152].mxu1  ;;  %v2313_v26 = vpop.f32.mrb[154].mxu0 }
 0x231   : > { %v2138_v43 = vadd.f32 %v2072_v21, %v5632_v2  ;;  %v4121_v44 = vpop.f32.mrb[153].mxu1  ;;  %v5755_v6 = vadd.f32 %v2313_v26, %v2137_v8  ;;  %v4174_v31 = vpop.f32.mrb[155].mxu0 }
 0x232   : > { %v2075_v0 = vpop.f32.mrb[154].mxu1 }
 0x233   : > { %v2139_v5 = vadd.f32 %v2075_v0, %v5636_v47  ;;  %v4122_v54 = vpop.f32.mrb[155].mxu1 }
 0x236   : > { %v2318_v10 = vpop.f32.mrb[156].mxu0 }
 0x237   : > { %v5758_v40 = vadd.f32 %v2318_v10, %v2138_v43  ;;  %v4177_v42 = vpop.f32.mrb[157].mxu0 }
 0x238   : > { %v2080_v30 = vpop.f32.mrb[156].mxu1  ;;  %v2321_v16 = vpop.f32.mrb[158].mxu0 }
 0x239   : > { %v2140_v58 = vadd.f32 %v2080_v30, %v5649_v38  ;;  %v4125_v15 = vpop.f32.mrb[157].mxu1  ;;  %v5761_v50 = vadd.f32 %v2321_v16, %v2139_v5  ;;  %v4178_v2 = vpop.f32.mrb[159].mxu0 }
 0x23a   : > { %v2083_v20 = vpop.f32.mrb[158].mxu1 }
 0x23b   : > { %v2141_v29 = vadd.f32 %v2083_v20, %v5653_v1  ;;  %v4126_v52 = vpop.f32.mrb[159].mxu1 }
 0x23e   : > { %v2326_v17 = vpop.f32.mrb[160].mxu0 }
 0x23f   : > { %v5764_v18 = vadd.f32 %v2326_v17, %v2140_v58  ;;  %v4181_v47 = vpop.f32.mrb[161].mxu0 }
 0x240   : > { %v2088_v19 = vpop.f32.mrb[160].mxu1  ;;  %v2329_v61 = vpop.f32.mrb[162].mxu0 }
 0x241   : > { %v2142_v24 = vadd.f32 %v2088_v19, %v5672_v63  ;;  %v4129_v23 = vpop.f32.mrb[161].mxu1  ;;  %v5767_v55 = vadd.f32 %v2329_v61, %v2141_v29  ;;  %v4182_v38 = vpop.f32.mrb[163].mxu0 }
 0x242   : > { %v2091_v9 = vpop.f32.mrb[162].mxu1 }
 0x243   : > { %v2143_v49 = vadd.f32 %v2091_v9, %v5676_v41  ;;  %v4130_v33 = vpop.f32.mrb[163].mxu1 }
 0x246   : > { %v2334_v59 = vpop.f32.mrb[164].mxu0 }
 0x247   : > { %v5770_v62 = vadd.f32 %v2334_v59, %v2142_v24  ;;  %v4185_v1 = vpop.f32.mrb[165].mxu0 }
 0x248   : > { %v2096_v27 = vpop.f32.mrb[164].mxu1  ;;  %v2337_v11 = vpop.f32.mrb[166].mxu0 }
 0x249   : > { %v2144_v37 = vadd.f32 %v2096_v27, %v5686_v25  ;;  %v4133_v34 = vpop.f32.mrb[165].mxu1  ;;  %v5773_v8 = vadd.f32 %v2337_v11, %v2143_v49  ;;  %v4186_v63 = vpop.f32.mrb[167].mxu0 }
 0x24a   : > { %v2099_v57 = vpop.f32.mrb[166].mxu1 }
 0x24b   : > { %v2145_v36 = vadd.f32 %v2099_v57, %v5690_v51  ;;  %v4134_v45 = vpop.f32.mrb[167].mxu1 }
 0x24e   : > { %v2342_v21 = vpop.f32.mrb[168].mxu0 }
 0x24f   : > { %v5776_v26 = vadd.f32 %v2342_v21, %v2144_v37  ;;  %v4189_v41 = vpop.f32.mrb[169].mxu0 }
 0x250   : > { %v2104_v43 = vpop.f32.mrb[168].mxu1  ;;  %v2345_v44 = vpop.f32.mrb[170].mxu0  ;;  %v5801_v41 = vld [vmem:[%s6027_s3] ss:$0 sm:$0xff] }
 0x251   : > { %v2146_v31 = vadd.f32 %v2104_v43, %v5701_v35  ;;  %v4137_v0 = vpop.f32.mrb[169].mxu1  ;;  %v5779_v5 = vadd.f32 %v2345_v44, %v2145_v36  ;;  %v4190_v25 = vpop.f32.mrb[171].mxu0 }
 0x252   : > { %v2107_v54 = vpop.f32.mrb[170].mxu1 }
 0x253   : > { %v2147_v10 = vadd.f32 %v2107_v54, %v5705_v56  ;;  %v4138_v42 = vpop.f32.mrb[171].mxu1 }
 0x256   : > { %v2350_v30 = vpop.f32.mrb[172].mxu0 }
 0x257   : > { %v5782_v16 = vadd.f32 %v2350_v30, %v2146_v31  ;;  %v4193_v51 = vpop.f32.mrb[173].mxu0 }
 0x258   : > { %v2112_v58 = vpop.f32.mrb[172].mxu1  ;;  %v2353_v15 = vpop.f32.mrb[174].mxu0 }
 0x259   : > { %v2148_v2 = vadd.f32 %v2112_v58, %v5712_v28  ;;  %v4141_v20 = vpop.f32.mrb[173].mxu1  ;;  %v5785_v29 = vadd.f32 %v2353_v15, %v2147_v10  ;;  %v4194_v35 = vpop.f32.mrb[175].mxu0 }
 0x25a   : > { %v2115_v52 = vpop.f32.mrb[174].mxu1 }
 0x25b   : > { %v2149_v17 = vadd.f32 %v2115_v52, %v5715_v7  ;;  %v4142_v47 = vpop.f32.mrb[175].mxu1 }
 0x25e   : > { %v2358_v19 = vpop.f32.mrb[176].mxu0 }
 0x25f   : > { %v5788_v61 = vadd.f32 %v2358_v19, %v2148_v2  ;;  %v4197_v56 = vpop.f32.mrb[177].mxu0 }
 0x260   : > { %v2120_v24 = vpop.f32.mrb[176].mxu1  ;;  %v2361_v23 = vpop.f32.mrb[178].mxu0 }
 0x261   : > { %v2150_v38 = vadd.f32 %v2120_v24, %v5718_v53  ;;  %v5791_v9 = vadd.f32 %v2361_v23, %v2149_v17  ;;  %v4198_v28 = vpop.f32.mrb[179].mxu0  ;;  %v4145_v49 = vpop.f32.mrb[177].mxu1 }
 0x262   : > { %v2123_v33 = vpop.f32.mrb[178].mxu1 }
 0x263   : > { %v4146_v59 = vpop.f32.mrb[179].mxu1 }
 0x266   : > { %v2366_v1 = vpop.f32.mrb[180].mxu0 }
 0x267   : > { %v5793_v27 = vadd.f32 %v2366_v1, %v2150_v38  ;;  %v4201_v7 = vpop.f32.mrb[181].mxu0 }
 0x268   : > { %v2549_v11 = vpop.f32.mrb[180].mxu1  ;;  %v2369_v37 = vpop.f32.mrb[182].mxu0 }
 0x269   : > { %v2651_v34 = vadd.f32 %v2549_v11, %v5722_v46  ;;  %v4209_v63 = vpop.f32.mrb[181].mxu1  ;;  %v4202_v57 = vpop.f32.mrb[183].mxu0 }
 0x26a   : > { %v2552_v36 = vpop.f32.mrb[182].mxu1 }
 0x26b   : > { %v2652_v53 = vadd.f32 %v2552_v36, %v5725_v39  ;;  %v4210_v45 = vpop.f32.mrb[183].mxu1 }
 0x26e   : > { %v2794_v21 = vpop.f32.mrb[184].mxu0 }
 0x26f   : > { %v2896_v43 = vadd.f32 %v2794_v21, %v2651_v34  ;;  %v4265_v44 = vpop.f32.mrb[185].mxu0 }
 0x270   : > { %v2557_v31 = vpop.f32.mrb[184].mxu1  ;;  %v2797_v0 = vpop.f32.mrb[186].mxu0 }
 0x271   : > { %v2653_v46 = vadd.f32 %v2557_v31, %v5728_v14  ;;  %v2928_v25 = vadd.f32 %v5801_v41, %v2896_v43  ;;  %v4213_v54 = vpop.f32.mrb[185].mxu1  ;;  %v2897_v10 = vadd.f32 %v2797_v0, %v2652_v53  ;;  %v4266_v39 = vpop.f32.mrb[187].mxu0 }
 0x272   : > { %v2560_v42 = vpop.f32.mrb[186].mxu1 }
 0x273   : > { %v3650_v30 = vpack.c.bf16 %v2928_v25, %v2928_v25  ;;  %v2654_v51 = vadd.f32 %v2560_v42, %v5731_v48  ;;  %v2929_v58 = vadd.f32 %v5801_v41, %v2897_v10  ;;  %v4214_v15 = vpop.f32.mrb[187].mxu1 }
 0x275   : > { %3055 = vst.msk [vmem:[%s5807_s15] sm:$0xf] %vm3054_vm12, %v3650_v30  ;;  %v3651_v14 = vpack.c.bf16 %v2929_v58, %v2929_v58 }
 0x276   : > { %v2802_v2 = vpop.f32.mrb[188].mxu0 }
 0x277   : > { %3056 = vst.msk [vmem:[%s5807_s15 + $0x4] sm:$0xf] %vm3054_vm12, %v3651_v14  ;;  %v2898_v20 = vadd.f32 %v2802_v2, %v2653_v46  ;;  %v4269_v35 = vpop.f32.mrb[189].mxu0 }
 0x278   : > { %v2565_v52 = vpop.f32.mrb[188].mxu1  ;;  %v2805_v17 = vpop.f32.mrb[190].mxu0 }
 0x279   : > { %v2655_v48 = vadd.f32 %v2565_v52, %v5734_v22  ;;  %v2930_v47 = vadd.f32 %v5801_v41, %v2898_v20  ;;  %v4217_v19 = vpop.f32.mrb[189].mxu1  ;;  %v2899_v56 = vadd.f32 %v2805_v17, %v2654_v51  ;;  %v4270_v24 = vpop.f32.mrb[191].mxu0 }
 0x27a   : > { %v2568_v23 = vpop.f32.mrb[190].mxu1 }
 0x27b   : > { %v3652_v38 = vpack.c.bf16 %v2930_v47, %v2930_v47  ;;  %v2656_v28 = vadd.f32 %v2568_v23, %v5737_v32  ;;  %v2931_v49 = vadd.f32 %v5801_v41, %v2899_v56  ;;  %v4218_v33 = vpop.f32.mrb[191].mxu1 }
 0x27d   : > { %3057 = vst.msk [vmem:[%s5807_s15 + $0x8] sm:$0xf] %vm3054_vm12, %v3652_v38  ;;  %v3653_v59 = vpack.c.bf16 %v2931_v49, %v2931_v49 }
 0x27e   : > { %v2810_v1 = vpop.f32.mrb[192].mxu0 }
 0x27f   : > { %3058 = vst.msk [vmem:[%s5807_s15 + $0xc] sm:$0xf] %vm3054_vm12, %v3653_v59  ;;  %v2900_v22 = vadd.f32 %v2810_v1, %v2655_v48  ;;  %v4273_v7 = vpop.f32.mrb[193].mxu0 }
 0x280   : > { %v2573_v11 = vpop.f32.mrb[192].mxu1  ;;  %v2813_v37 = vpop.f32.mrb[194].mxu0 }
 0x281   : > { %v2657_v34 = vadd.f32 %v2573_v11, %v5740_v13  ;;  %v2932_v63 = vadd.f32 %v5801_v41, %v2900_v22  ;;  %v4221_v32 = vpop.f32.mrb[193].mxu1  ;;  %v2901_v57 = vadd.f32 %v2813_v37, %v2656_v28  ;;  %v4274_v36 = vpop.f32.mrb[195].mxu0 }
 0x282   : > { %v2576_v53 = vpop.f32.mrb[194].mxu1 }
 0x283   : > { %v3654_v45 = vpack.c.bf16 %v2932_v63, %v2932_v63  ;;  %v2658_v21 = vadd.f32 %v2576_v53, %v5743_v3  ;;  %v2933_v43 = vadd.f32 %v5801_v41, %v2901_v57  ;;  %v4222_v44 = vpop.f32.mrb[195].mxu1 }
 0x285   : > { %3059 = vst.msk [vmem:[%s5807_s15 + $0x10] sm:$0xf] %vm3054_vm12, %v3654_v45  ;;  %v3655_v31 = vpack.c.bf16 %v2933_v43, %v2933_v43 }
 0x286   : > { %v2818_v0 = vpop.f32.mrb[196].mxu0 }
 0x287   : > { %3060 = vst.msk [vmem:[%s5807_s15 + $0x14] sm:$0xf] %vm3054_vm12, %v3655_v31  ;;  %v2902_v13 = vadd.f32 %v2818_v0, %v2657_v34  ;;  %v4277_v46 = vpop.f32.mrb[197].mxu0 }
 0x288   : > { %v2581_v25 = vpop.f32.mrb[196].mxu1  ;;  %v2821_v54 = vpop.f32.mrb[198].mxu0 }
 0x289   : > { %v2659_v10 = vadd.f32 %v2581_v25, %v5746_v60  ;;  %v2934_v39 = vadd.f32 %v5801_v41, %v2902_v13  ;;  %v4225_v3 = vpop.f32.mrb[197].mxu1  ;;  %v2903_v42 = vadd.f32 %v2821_v54, %v2658_v21  ;;  %v4278_v30 = vpop.f32.mrb[199].mxu0 }
 0x28a   : > { %v2584_v51 = vpop.f32.mrb[198].mxu1 }
 0x28b   : > { %v3656_v58 = vpack.c.bf16 %v2934_v39, %v2934_v39  ;;  %v2660_v15 = vadd.f32 %v2584_v51, %v5749_v12  ;;  %v2935_v14 = vadd.f32 %v5801_v41, %v2903_v42  ;;  %v4226_v2 = vpop.f32.mrb[199].mxu1 }
 0x28d   : > { %3061 = vst.msk [vmem:[%s5807_s15 + $0x18] sm:$0xf] %vm3054_vm12, %v3656_v58  ;;  %v3657_v20 = vpack.c.bf16 %v2935_v14, %v2935_v14 }
 0x28e   : > { %v2826_v35 = vpop.f32.mrb[200].mxu0 }
 0x28f   : > { %3062 = vst.msk [vmem:[%s5807_s15 + $0x1c] sm:$0xf] %vm3054_vm12, %v3657_v20  ;;  %v2904_v60 = vadd.f32 %v2826_v35, %v2659_v10  ;;  %v4281_v52 = vpop.f32.mrb[201].mxu0 }
 0x290   : > { %v2589_v17 = vpop.f32.mrb[200].mxu1  ;;  %v2829_v48 = vpop.f32.mrb[202].mxu0 }
 0x291   : > { %v2661_v47 = vadd.f32 %v2589_v17, %v5752_v4  ;;  %v2936_v19 = vadd.f32 %v5801_v41, %v2904_v60  ;;  %v4229_v12 = vpop.f32.mrb[201].mxu1  ;;  %v2905_v56 = vadd.f32 %v2829_v48, %v2660_v15  ;;  %v4282_v24 = vpop.f32.mrb[203].mxu0 }
 0x292   : > { %v2592_v23 = vpop.f32.mrb[202].mxu1 }
 0x293   : > { %v3658_v38 = vpack.c.bf16 %v2936_v19, %v2936_v19  ;;  %v2662_v28 = vadd.f32 %v2592_v23, %v5755_v6  ;;  %v2937_v49 = vadd.f32 %v5801_v41, %v2905_v56  ;;  %v4230_v33 = vpop.f32.mrb[203].mxu1 }
 0x295   : > { %3063 = vst.msk [vmem:[%s5807_s15 + $0x20] sm:$0xf] %vm3054_vm12, %v3658_v38  ;;  %v3659_v59 = vpack.c.bf16 %v2937_v49, %v2937_v49 }
 0x296   : > { %v2834_v1 = vpop.f32.mrb[204].mxu0 }
 0x297   : > { %3064 = vst.msk [vmem:[%s5807_s15 + $0x24] sm:$0xf] %vm3054_vm12, %v3659_v59  ;;  %v2906_v4 = vadd.f32 %v2834_v1, %v2661_v47  ;;  %v4285_v22 = vpop.f32.mrb[205].mxu0 }
 0x298   : > { %v2597_v7 = vpop.f32.mrb[204].mxu1  ;;  %v2837_v11 = vpop.f32.mrb[206].mxu0 }
 0x299   : > { %v2663_v37 = vadd.f32 %v2597_v7, %v5758_v40  ;;  %v2938_v34 = vadd.f32 %v5801_v41, %v2906_v4  ;;  %v4233_v6 = vpop.f32.mrb[205].mxu1  ;;  %v2907_v63 = vadd.f32 %v2837_v11, %v2662_v28  ;;  %v4286_v32 = vpop.f32.mrb[207].mxu0 }
 0x29a   : > { %v2600_v57 = vpop.f32.mrb[206].mxu1 }
 0x29b   : > { %v3660_v36 = vpack.c.bf16 %v2938_v34, %v2938_v34  ;;  %v2664_v53 = vadd.f32 %v2600_v57, %v5761_v50  ;;  %v2939_v45 = vadd.f32 %v5801_v41, %v2907_v63  ;;  %v4234_v21 = vpop.f32.mrb[207].mxu1 }
 0x29d   : > { %3065 = vst.msk [vmem:[%s5807_s15 + $0x28] sm:$0xf] %vm3054_vm12, %v3660_v36  ;;  %v3661_v43 = vpack.c.bf16 %v2939_v45, %v2939_v45 }
 0x29e   : > { %v2842_v44 = vpop.f32.mrb[208].mxu0 }
 0x29f   : > { %3066 = vst.msk [vmem:[%s5807_s15 + $0x2c] sm:$0xf] %vm3054_vm12, %v3661_v43  ;;  %v2908_v40 = vadd.f32 %v2842_v44, %v2663_v37  ;;  %v4289_v31 = vpop.f32.mrb[209].mxu0 }
 0x2a0   : > { %v2605_v0 = vpop.f32.mrb[208].mxu1  ;;  %v2845_v13 = vpop.f32.mrb[210].mxu0 }
 0x2a1   : > { %v2665_v46 = vadd.f32 %v2605_v0, %v5764_v18  ;;  %v2940_v25 = vadd.f32 %v5801_v41, %v2908_v40  ;;  %v4237_v50 = vpop.f32.mrb[209].mxu1  ;;  %v2909_v54 = vadd.f32 %v2845_v13, %v2664_v53  ;;  %v4290_v10 = vpop.f32.mrb[211].mxu0 }
 0x2a2   : > { %v2608_v39 = vpop.f32.mrb[210].mxu1 }
 0x2a3   : > { %v3662_v3 = vpack.c.bf16 %v2940_v25, %v2940_v25  ;;  %v2666_v42 = vadd.f32 %v2608_v39, %v5767_v55  ;;  %v2941_v30 = vadd.f32 %v5801_v41, %v2909_v54  ;;  %v4238_v51 = vpop.f32.mrb[211].mxu1 }
 0x2a5   : > { %3067 = vst.msk [vmem:[%s5807_s15 + $0x30] sm:$0xf] %vm3054_vm12, %v3662_v3  ;;  %v3663_v58 = vpack.c.bf16 %v2941_v30, %v2941_v30 }
 0x2a6   : > { %v2850_v15 = vpop.f32.mrb[212].mxu0 }
 0x2a7   : > { %3068 = vst.msk [vmem:[%s5807_s15 + $0x34] sm:$0xf] %vm3054_vm12, %v3663_v58  ;;  %v2910_v18 = vadd.f32 %v2850_v15, %v2665_v46  ;;  %v4293_v14 = vpop.f32.mrb[213].mxu0 }
 0x2a8   : > { %v2613_v2 = vpop.f32.mrb[212].mxu1  ;;  %v2853_v20 = vpop.f32.mrb[214].mxu0 }
 0x2a9   : > { %v2667_v35 = vadd.f32 %v2613_v2, %v5770_v62  ;;  %v2942_v60 = vadd.f32 %v5801_v41, %v2910_v18  ;;  %v4241_v55 = vpop.f32.mrb[213].mxu1  ;;  %v2911_v52 = vadd.f32 %v2853_v20, %v2666_v42  ;;  %v4294_v17 = vpop.f32.mrb[215].mxu0 }
 0x2aa   : > { %v2616_v48 = vpop.f32.mrb[214].mxu1 }
 0x2ab   : > { %v3664_v47 = vpack.c.bf16 %v2942_v60, %v2942_v60  ;;  %v2668_v19 = vadd.f32 %v2616_v48, %v5773_v8  ;;  %v2943_v12 = vadd.f32 %v5801_v41, %v2911_v52  ;;  %v4242_v56 = vpop.f32.mrb[215].mxu1 }
 0x2ad   : > { %3069 = vst.msk [vmem:[%s5807_s15 + $0x38] sm:$0xf] %vm3054_vm12, %v3664_v47  ;;  %v3665_v24 = vpack.c.bf16 %v2943_v12, %v2943_v12 }
 0x2ae   : > { %v2858_v23 = vpop.f32.mrb[216].mxu0 }
 0x2af   : > { %3070 = vst.msk [vmem:[%s5807_s15 + $0x3c] sm:$0xf] %vm3054_vm12, %v3665_v24  ;;  %v2912_v62 = vadd.f32 %v2858_v23, %v2667_v35  ;;  %v4297_v38 = vpop.f32.mrb[217].mxu0 }
 0x2b0   : > { %v2621_v28 = vpop.f32.mrb[216].mxu1  ;;  %v2861_v49 = vpop.f32.mrb[218].mxu0 }
 0x2b1   : > { %v2669_v33 = vadd.f32 %v2621_v28, %v5776_v26  ;;  %v2944_v59 = vadd.f32 %v5801_v41, %v2912_v62  ;;  %v4245_v8 = vpop.f32.mrb[217].mxu1  ;;  %v2913_v1 = vadd.f32 %v2861_v49, %v2668_v19  ;;  %v4298_v4 = vpop.f32.mrb[219].mxu0 }
 0x2b2   : > { %v2624_v22 = vpop.f32.mrb[218].mxu1 }
 0x2b3   : > { %v3666_v7 = vpack.c.bf16 %v2944_v59, %v2944_v59  ;;  %v2670_v11 = vadd.f32 %v2624_v22, %v5779_v5  ;;  %v2945_v37 = vadd.f32 %v5801_v41, %v2913_v1  ;;  %v4246_v34 = vpop.f32.mrb[219].mxu1 }
 0x2b5   : > { %3071 = vst.msk [vmem:[%s5807_s15 + $0x40] sm:$0xf] %vm3054_vm12, %v3666_v7  ;;  %v3667_v6 = vpack.c.bf16 %v2945_v37, %v2945_v37 }
 0x2b6   : > { %v2866_v63 = vpop.f32.mrb[220].mxu0 }
 0x2b7   : > { %3072 = vst.msk [vmem:[%s5807_s15 + $0x44] sm:$0xf] %vm3054_vm12, %v3667_v6  ;;  %v2914_v26 = vadd.f32 %v2866_v63, %v2669_v33  ;;  %v4301_v32 = vpop.f32.mrb[221].mxu0 }
 0x2b8   : > { %v2629_v57 = vpop.f32.mrb[220].mxu1  ;;  %v2869_v36 = vpop.f32.mrb[222].mxu0 }
 0x2b9   : > { %v2671_v53 = vadd.f32 %v2629_v57, %v5782_v16  ;;  %v2946_v45 = vadd.f32 %v5801_v41, %v2914_v26  ;;  %v4249_v5 = vpop.f32.mrb[221].mxu1  ;;  %v2915_v21 = vadd.f32 %v2869_v36, %v2670_v11  ;;  %v4302_v43 = vpop.f32.mrb[223].mxu0 }
 0x2ba   : > { %v2632_v44 = vpop.f32.mrb[222].mxu1 }
 0x2bb   : > { %v3668_v40 = vpack.c.bf16 %v2946_v45, %v2946_v45  ;;  %v2672_v31 = vadd.f32 %v2632_v44, %v5785_v29  ;;  %v2947_v0 = vadd.f32 %v5801_v41, %v2915_v21  ;;  %v4250_v13 = vpop.f32.mrb[223].mxu1 }
 0x2bd   : > { %3073 = vst.msk [vmem:[%s5807_s15 + $0x48] sm:$0xf] %vm3054_vm12, %v3668_v40  ;;  %v3669_v46 = vpack.c.bf16 %v2947_v0, %v2947_v0 }
 0x2be   : > { %v2874_v25 = vpop.f32.mrb[224].mxu0 }
 0x2bf   : > { %3074 = vst.msk [vmem:[%s5807_s15 + $0x4c] sm:$0xf] %vm3054_vm12, %v3669_v46  ;;  %v2916_v16 = vadd.f32 %v2874_v25, %v2671_v53  ;;  %v4305_v50 = vpop.f32.mrb[225].mxu0 }
 0x2c0   : > { %v2637_v54 = vpop.f32.mrb[224].mxu1  ;;  %v2877_v10 = vpop.f32.mrb[226].mxu0 }
 0x2c1   : > { %v2673_v39 = vadd.f32 %v2637_v54, %v5788_v61  ;;  %v2948_v3 = vadd.f32 %v5801_v41, %v2916_v16  ;;  %v4253_v29 = vpop.f32.mrb[225].mxu1  ;;  %v2917_v42 = vadd.f32 %v2877_v10, %v2672_v31  ;;  %v4306_v30 = vpop.f32.mrb[227].mxu0 }
 0x2c2   : > { %v2640_v51 = vpop.f32.mrb[226].mxu1 }
 0x2c3   : > { %v3670_v58 = vpack.c.bf16 %v2948_v3, %v2948_v3  ;;  %v2674_v15 = vadd.f32 %v2640_v51, %v5791_v9  ;;  %v2949_v18 = vadd.f32 %v5801_v41, %v2917_v42  ;;  %v4254_v14 = vpop.f32.mrb[227].mxu1 }
 0x2c5   : > { %3075 = vst.msk [vmem:[%s5807_s15 + $0x50] sm:$0xf] %vm3054_vm12, %v3670_v58  ;;  %v3671_v2 = vpack.c.bf16 %v2949_v18, %v2949_v18 }
 0x2c6   : > { %v2882_v20 = vpop.f32.mrb[228].mxu0 }
 0x2c7   : > { %3076 = vst.msk [vmem:[%s5807_s15 + $0x54] sm:$0xf] %vm3054_vm12, %v3671_v2  ;;  %v2918_v61 = vadd.f32 %v2882_v20, %v2673_v39  ;;  %v4309_v35 = vpop.f32.mrb[229].mxu0 }
 0x2c8   : > { %v2645_v60 = vpop.f32.mrb[228].mxu1  ;;  %v2885_v55 = vpop.f32.mrb[230].mxu0 }
 0x2c9   : > { %v2675_v52 = vadd.f32 %v2645_v60, %v5793_v27  ;;  %v2950_v17 = vadd.f32 %v5801_v41, %v2918_v61  ;;  %v2919_v9 = vadd.f32 %v2885_v55, %v2674_v15  ;;  %v4310_v48 = vpop.f32.mrb[231].mxu0  ;;  %v4257_v47 = vpop.f32.mrb[229].mxu1 }
 0x2ca   : > { %v2648_v19 = vpop.f32.mrb[230].mxu1 }
 0x2cb   : > { %v3672_v12 = vpack.c.bf16 %v2950_v17, %v2950_v17  ;;  %v2951_v56 = vadd.f32 %v5801_v41, %v2919_v9  ;;  %v4258_v24 = vpop.f32.mrb[231].mxu1 }
 0x2cd   : > { %3077 = vst.msk [vmem:[%s5807_s15 + $0x58] sm:$0xf] %vm3054_vm12, %v3672_v12  ;;  %v3673_v23 = vpack.c.bf16 %v2951_v56, %v2951_v56 }
 0x2ce   : > { %v2890_v62 = vpop.f32.mrb[232].mxu0 }
 0x2cf   : > { %3078 = vst.msk [vmem:[%s5807_s15 + $0x5c] sm:$0xf] %vm3054_vm12, %v3673_v23  ;;  %v2920_v38 = vadd.f32 %v2890_v62, %v2675_v52  ;;  %v4313_v28 = vpop.f32.mrb[233].mxu0  ;;  %3086 = sbr.rel (!%p4649_p3) target bundleno = 804 (0x324), region = 40 }
 0x2d0   : > { %v2893_v27 = vpop.f32.mrb[234].mxu0 }
 0x2d1   : > { %v2952_v49 = vadd.f32 %v5801_v41, %v2920_v38  ;;  %v4314_v33 = vpop.f32.mrb[235].mxu0 }
 0x2d3   : > { %v3674_v59 = vpack.c.bf16 %v2952_v49, %v2952_v49 }
 0x2d5   : > { %3079 = vst.msk [vmem:[%s5807_s15 + $0x60] sm:$0xf] %vm3054_vm12, %v3674_v59 }
 0x2d6   : > { %s6072_s26 = smov (!%p3089_p10, %s3088_s26), 25 }
 0x2d7   : > { %s3638_s6 = sshll.u32 %s6072_s26, 6 }
 0x2d8   : > { %p3641_p11 = scmp.eq.s32.totalorder %s3638_s6, 0 }
 0x2d9   : > { %4482 = sdivrem.u32 (!%p3641_p11), %s6072_s26, 25 }
 0x2da   : > { %3098 = sbr.rel (%p3641_p11) target bundleno = 804 (0x324), region = 44 }
 0x2e2   : > { %s5916_s23 = spop.drf %4482 }
 0x2e3   : > { %p3642_p12 = scmp.le.s32.totalorder %s5916_s23, 0 }
 0x2e4   : > { %s6060_s17 = smov (!%p3642_p12), %s5910_s5  ;;  %s6061_s30 = smov (!%p3642_p12), %s5807_s15 }
 0x2e5   : > { %3366 = sbr.rel (%p3642_p12) target bundleno = 775 (0x307), region = 125  ;;  %s5925_s7 = smov (!%p3642_p12), 0  }
 0x2e6   : > { %s5927_s8 = smov (!%p3642_p12), 0  }
 0x2ec LB: >> { %v3115_v41 = vld [vmem:[%s4564_s30] sm:$0xf]  ;;  %v3117_v8 = vld [vmem:[%s4564_s30 + $0x4] sm:$0xf]  ;;  %v3119_v1 = vld [vmem:[%s4564_s30 + $0x8] sm:$0xf]  ;;  %s4572_s8 = sphi %s5927_s8, %s3109_s8   ;;  %s4568_s7 = sphi %s5925_s7, %s6062_s7   ;;  %s4564_s30 = sphi %s6061_s30, %s3170_s30   ;;  %s4560_s17 = sphi %s6060_s17, %s3171_s17  }
 0x2ed   : >> { %3116 = vst [vmem:[%s4560_s17] sm:$0xf] %v3115_v41  ;;  %3118 = vst [vmem:[%s4560_s17 + $0x4] sm:$0xf] %v3117_v8  ;;  %v3121_v4 = vld [vmem:[%s4564_s30 + $0xc] sm:$0xf]  ;;  %s3165_s9 = sadd.s32 1, %s4568_s7 }
 0x2ee   : >> { %3120 = vst [vmem:[%s4560_s17 + $0x8] sm:$0xf] %v3119_v1  ;;  %v3123_v22 = vld [vmem:[%s4564_s30 + $0x10] sm:$0xf]  ;;  %v3125_v7 = vld [vmem:[%s4564_s30 + $0x14] sm:$0xf]  ;;  %p3166_p13 = scmp.ge.s32.totalorder %s3165_s9, %s5916_s23 }
 0x2ef   : >> { %3122 = vst [vmem:[%s4560_s17 + $0xc] sm:$0xf] %v3121_v4  ;;  %3124 = vst [vmem:[%s4560_s17 + $0x10] sm:$0xf] %v3123_v22  ;;  %v3127_v11 = vld [vmem:[%s4564_s30 + $0x18] sm:$0xf] }
 0x2f0   : >> { %3126 = vst [vmem:[%s4560_s17 + $0x14] sm:$0xf] %v3125_v7  ;;  %v3129_v37 = vld [vmem:[%s4564_s30 + $0x1c] sm:$0xf]  ;;  %v3131_v34 = vld [vmem:[%s4564_s30 + $0x20] sm:$0xf] }
 0x2f1   : >> { %3128 = vst [vmem:[%s4560_s17 + $0x18] sm:$0xf] %v3127_v11  ;;  %3130 = vst [vmem:[%s4560_s17 + $0x1c] sm:$0xf] %v3129_v37  ;;  %v3133_v6 = vld [vmem:[%s4564_s30 + $0x24] sm:$0xf] }
 0x2f2   : >> { %3132 = vst [vmem:[%s4560_s17 + $0x20] sm:$0xf] %v3131_v34  ;;  %v3135_v63 = vld [vmem:[%s4564_s30 + $0x28] sm:$0xf]  ;;  %v3137_v26 = vld [vmem:[%s4564_s30 + $0x2c] sm:$0xf] }
 0x2f3   : >> { %3134 = vst [vmem:[%s4560_s17 + $0x24] sm:$0xf] %v3133_v6  ;;  %3136 = vst [vmem:[%s4560_s17 + $0x28] sm:$0xf] %v3135_v63  ;;  %v3139_v32 = vld [vmem:[%s4564_s30 + $0x30] sm:$0xf] }
 0x2f4   : >> { %3138 = vst [vmem:[%s4560_s17 + $0x2c] sm:$0xf] %v3137_v26  ;;  %v3141_v57 = vld [vmem:[%s4564_s30 + $0x34] sm:$0xf]  ;;  %v3143_v36 = vld [vmem:[%s4564_s30 + $0x38] sm:$0xf] }
 0x2f5   : >> { %3140 = vst [vmem:[%s4560_s17 + $0x30] sm:$0xf] %v3139_v32  ;;  %3142 = vst [vmem:[%s4560_s17 + $0x34] sm:$0xf] %v3141_v57  ;;  %v3145_v53 = vld [vmem:[%s4564_s30 + $0x3c] sm:$0xf] }
 0x2f6   : >> { %3144 = vst [vmem:[%s4560_s17 + $0x38] sm:$0xf] %v3143_v36  ;;  %v3147_v45 = vld [vmem:[%s4564_s30 + $0x40] sm:$0xf]  ;;  %v3149_v5 = vld [vmem:[%s4564_s30 + $0x44] sm:$0xf] }
 0x2f7   : >> { %3146 = vst [vmem:[%s4560_s17 + $0x3c] sm:$0xf] %v3145_v53  ;;  %3148 = vst [vmem:[%s4560_s17 + $0x40] sm:$0xf] %v3147_v45  ;;  %v3151_v21 = vld [vmem:[%s4564_s30 + $0x48] sm:$0xf] }
 0x2f8   : >> { %3150 = vst [vmem:[%s4560_s17 + $0x44] sm:$0xf] %v3149_v5  ;;  %v3153_v43 = vld [vmem:[%s4564_s30 + $0x4c] sm:$0xf]  ;;  %v3155_v44 = vld [vmem:[%s4564_s30 + $0x50] sm:$0xf] }
 0x2f9   : >> { %3152 = vst [vmem:[%s4560_s17 + $0x48] sm:$0xf] %v3151_v21  ;;  %3154 = vst [vmem:[%s4560_s17 + $0x4c] sm:$0xf] %v3153_v43  ;;  %v3157_v40 = vld [vmem:[%s4564_s30 + $0x54] sm:$0xf] }
 0x2fa   : >> { %3156 = vst [vmem:[%s4560_s17 + $0x50] sm:$0xf] %v3155_v44  ;;  %v3159_v31 = vld [vmem:[%s4564_s30 + $0x58] sm:$0xf]  ;;  %v3161_v0 = vld [vmem:[%s4564_s30 + $0x5c] sm:$0xf] }
 0x2fb   : >> { %3158 = vst [vmem:[%s4560_s17 + $0x54] sm:$0xf] %v3157_v40  ;;  %3160 = vst [vmem:[%s4560_s17 + $0x58] sm:$0xf] %v3159_v31  ;;  %v3163_v13 = vld [vmem:[%s4564_s30 + $0x60] sm:$0xf] }
 0x2fc   : >> { %3162 = vst [vmem:[%s4560_s17 + $0x5c] sm:$0xf] %v3161_v0  ;;  %3164 = vst [vmem:[%s4560_s17 + $0x60] sm:$0xf] %v3163_v13  ;;  %s6074_s9 = smov (%p3166_p13, %s3165_s9), 0  ;;  %s3109_s8 = sadd.s32 1, %s4572_s8  }
 0x2fd   : >> { %s3168_s10 = smul.u32 100, %s6074_s9  ;;  %p3108_p0 = scmp.ge.s32.totalorder %s3109_s8, %s5916_s23 }
 0x2fe   : >> { %s6062_s7 = smov %s6074_s9 }
 0x2ff   : >> { %s3170_s30 = scalar_lea.vmem %s5807_s15, %s3168_s10 [#allocation3]   ;;  %s3171_s17 = scalar_lea.vmem %s5910_s5, %s3168_s10  }
 0x300   : > { %3111 = sbr.rel (!%p3108_p0) target bundleno = 748 (0x2ec), region = 131 }
 0x307 PF: > { %4484 = sdivrem.u32 %s6072_s26, 25 }
 0x308   : > { %s3643_s11 = smul.u32 100, %s5916_s23 }
 0x30a   : > { %s3176_s12 = scalar_lea.vmem %s5807_s15, %s3643_s11 [#allocation3]   ;;  %s3178_s13 = scalar_lea.vmem %s5910_s5, %s3643_s11  }
 0x310   : > { %s4485_s14 = spop.drf %4484 }
 0x311   : > { %p3645_p1 = scmp.le.s32.totalorder %s4485_s14, 0 }
 0x312   : > { %s4574_s20 = smov (!%p3645_p1), %s3178_s13   ;;  %s4578_s22 = smov (!%p3645_p1), %s3176_s12  }
 0x313   : > { %3380 = sbr.rel (%p3645_p1) target bundleno = 804 (0x324), region = 136  ;;  %s4582_s24 = smov (!%p3645_p1), 0  }
 0x314   : > { %s4586_s27 = smov (!%p3645_p1), 0  }
 0x31a LB: >> { %v3188_v46 = vld [vmem:[%s4580_s22] sm:$0xf]  ;;  %s3190_s28 = sadd.s32 1, %s4584_s24  ;;  %s3182_s27 = sadd.s32 1, %s4588_s27   ;;  %s4588_s27 = sphi %s4586_s27, %s3182_s27   ;;  %s4584_s24 = sphi %s4582_s24, %s4583_s24   ;;  %s4580_s22 = sphi %s4578_s22, %s3195_s22   ;;  %s4576_s20 = sphi %s4574_s20, %s3196_s20  }
 0x31b   : >> { %3189 = vst [vmem:[%s4576_s20] sm:$0xf] %v3188_v46  ;;  %p3191_p2 = scmp.ge.s32.totalorder %s3190_s28, %s4485_s14  ;;  %p3181_p3 = scmp.ge.s32.totalorder %s3182_s27, %s4485_s14 }
 0x31d   : >> { %s6076_s28 = smov (%p3191_p2, %s3190_s28), 0  ;;  %3184 = sbr.rel (!%p3181_p3) target bundleno = 794 (0x31a), region = 142 }
 0x31e   : >> { %s3646_s15 = sshll.u32 %s6076_s28, 2  ;;  %s4583_s24 = smov %s6076_s28  }
 0x31f   : >> { %s3195_s22 = scalar_lea.vmem %s3176_s12, %s3646_s15 [#allocation3]   ;;  %s3196_s20 = scalar_lea.vmem %s3178_s13, %s3646_s15  }
 0x324 PF: > { %s14_s19 = sadd.s32 1, %s4556_s19   ;;  %s6063_s15 = smov %s4544_s16 }
 0x325   : > { %p11_p4 = scmp.ge.s32.totalorder %s14_s19, 5   ;;  %s6064_s16 = smov %s4658_s25 }
 0x326   : > { %s6065_s17 = smov %s4552_s18  ;;  %s6066_s18 = smov %s6068_s21 }
 0x327   :  { %13 = sbr.rel (!%p11_p4) target bundleno = 3 (0x3), region = 153 }

</bundles_post_ra>
